<compile_context>
chip_gen: v7x
topology: tpu7x:2x2x1
jax: 0.10.0
libtpu: 0.0.40
codegen_flags: <defaults>
</compile_context>

<pallas_src>
import jax
import jax.numpy as jnp
from jax.experimental import pallas as pl
from jax.experimental.pallas import tpu as pltpu


def _make_kernel(tb, rows_per_batch, L, cin, c_last, use_bf16):
    """rows_per_batch = num_signals * L; the kernel works on M = tb*rows_per_batch rows."""
    M = tb * rows_per_batch
    inv_count = 1.0 / float(rows_per_batch)      # fused mean over L and over signals
    mm_dtype = jnp.bfloat16 if use_bf16 else jnp.float32

    def conv3_relu(x, is_first, is_last, w_ref, b_ref):
        """Conv1d(kernel=3, padding=1) + bias + ReLU over (M, Cin) rows.

        Three accumulating MXU matmuls (one per tap).  The shifted copies come
        from an XLU sublane roll; the wrapped boundary rows (l==0 / l==L-1 of
        every (batch, signal) group) are zeroed, giving exact 'same' zero pad.
        """
        x_prev = jnp.where(is_first, 0.0, pltpu.roll(x, shift=1, axis=0))
        x_next = jnp.where(is_last, 0.0, pltpu.roll(x, shift=M - 1, axis=0))
        y = (jnp.dot(x.astype(mm_dtype), w_ref[1], preferred_element_type=jnp.float32)
             + jnp.dot(x_prev.astype(mm_dtype), w_ref[0], preferred_element_type=jnp.float32)
             + jnp.dot(x_next.astype(mm_dtype), w_ref[2], preferred_element_type=jnp.float32)
             + b_ref[...])
        return jnp.maximum(y, 0.0)

    def kernel(x_ref, w1_ref, b1_ref, w2_ref, b2_ref, w3_ref, b3_ref,
               fcw_ref, fcb_ref, out_ref):
        # (tb, N*L, Cin) -> (M, Cin): collapses leading dims only (layout-free
        # when (N*L) % 8 == 0, true for the demo shapes).
        x = x_ref[...].reshape(M, cin)

        # Boundary masks, computed once and shared by all three conv layers.
        # Row r has l = r % L because the (batch, signal) groups are contiguous
        # blocks of L rows.
        row = jax.lax.broadcasted_iota(jnp.int32, (M, 1), 0)
        l_of_row = row % L
        is_first = l_of_row == 0
        is_last = l_of_row == (L - 1)

        h = conv3_relu(x, is_first, is_last, w1_ref, b1_ref)     # (M, 16)
        h = conv3_relu(h, is_first, is_last, w2_ref, b2_ref)     # (M, 32)
        h = conv3_relu(h, is_first, is_last, w3_ref, b3_ref)     # (M, 64)

        # adaptive_avg_pool1d(1) over L fused with the mean over signals, then the
        # final Linear on the aggregated features (exact: Linear is affine, so
        # FC(mean) == mean(FC)).  Nothing of size (B*N, ...) ever leaves the tile.
        pooled = jnp.sum(h.reshape(tb, rows_per_batch, c_last), axis=1) * inv_count
        out_ref[...] = (jnp.dot(pooled.astype(mm_dtype), fcw_ref[...],
                                preferred_element_type=jnp.float32)
                        + fcb_ref[...]).astype(out_ref.dtype)

    return kernel


def _plan_batch_tiling(B, rows_per_batch, max_rows_per_tile):
    """Pick (padded batch Bp, batch tile tb).

    Budget note: per row, the double-buffered input block costs 128 lanes * 4 B *
    2 buffers = 1 KiB of VMEM (the Cin=16 minor dim lane-pads 8x), so the default
    max_rows_per_tile=4096 keeps the pipelined input under ~4 MiB plus a few MiB
    of activation temporaries — safe on v7x's 64 MiB VMEM.  On v5e/v6e (128 MiB)
    raise it to 8192-16384 together with vmem_limit_bytes.
    """
    cap_tb = max_rows_per_tile // max(rows_per_batch, 1)
    if cap_tb < 1:
        # TODO(synk): for extremely long N*L slabs fall back to a second grid
        # axis over signal chunks (the old reduction-axis path); not needed here.
        return B, B
    if B <= 8 and B <= cap_tb:
        return B, B                              # one full-batch tile (demo size)
    cap_tb = max(8, (cap_tb // 8) * 8)
    best, best_key = None, None
    for tb in range(8, cap_tb + 1, 8):           # tb % 8 == 0: output-block sublane rule
        Bp = -(-B // tb) * tb                    # pad batch up to a multiple of tb
        if B > 8 and Bp // tb < 2:
            continue                             # keep >= 2 tiles so both v7x TCs get work
        key = (Bp - B, -tb)                      # least padding, then biggest tile
        if best_key is None or key < best_key:
            best_key, best = key, (Bp, tb)
    if best is None:
        tb = cap_tb
        best = (-(-B // tb) * tb, tb)
    return best


def aggregate_forward(signals, params, *, max_rows_per_tile=4096,
                      vmem_limit_bytes=48 * 1024 * 1024, use_bf16=False):
    """signals: (B, num_signals, C_in, L) float32 (PyTorch layout). Returns (B, num_classes)."""
    (w1, b1), (w2, b2), (w3, b3), (fcw, fcb) = params
    B, N, Cin, L = signals.shape
    num_classes = fcw.shape[1]
    c_last = w3.shape[-1]
    rows_per_batch = N * L

    # Channels-last with the signal axis folded into the row dimension:
    # (B, N, Cin, L) -> (B, N, L, Cin) -> (B, N*L, Cin).
    x = jnp.transpose(signals, (0, 1, 3, 2)).reshape(B, rows_per_batch, Cin)

    Bp, tb = _plan_batch_tiling(B, rows_per_batch, max_rows_per_tile)
    if Bp != B:
        x = jnp.pad(x, ((0, Bp - B), (0, 0), (0, 0)))  # padded rows sliced off below

    if use_bf16:  # cast only the MXU operands; accumulation & elementwise stay f32
        w1 = w1.astype(jnp.bfloat16)
        w2 = w2.astype(jnp.bfloat16)
        w3 = w3.astype(jnp.bfloat16)
        fcw = fcw.astype(jnp.bfloat16)

    kernel = _make_kernel(tb, rows_per_batch, L, Cin, c_last, use_bf16)

    def _resident(arr):                          # fetched once, stays VMEM-resident
        nd = arr.ndim
        return pl.BlockSpec(arr.shape, lambda i: (0,) * nd)

    out = pl.pallas_call(
        kernel,
        out_shape=jax.ShapeDtypeStruct((Bp, num_classes), jnp.float32),
        grid_spec=pltpu.PrefetchScalarGridSpec(
            num_scalar_prefetch=0,
            grid=(Bp // tb,),                    # single "parallel" batch-tile axis
            in_specs=[
                pl.BlockSpec((tb, rows_per_batch, Cin), lambda i: (i, 0, 0)),
                _resident(w1), _resident(b1),
                _resident(w2), _resident(b2),
                _resident(w3), _resident(b3),
                _resident(fcw), _resident(fcb),
            ],
            out_specs=pl.BlockSpec((tb, num_classes), lambda i: (i, 0)),
        ),
        compiler_params=pltpu.CompilerParams(
            dimension_semantics=("parallel",),
            vmem_limit_bytes=vmem_limit_bytes,   # <= ~48 MiB: safe on v7x; raise on v5e/v6e
        ),
    )(x, w1, b1, w2, b2, w3, b3, fcw, fcb)
    return out[:B] if Bp != B else out


def init_params(key, input_channels, num_classes=32):
    """Deterministic synthetic parameters; shapes match the PyTorch module.

    Conv weights are stored as (K=3, Cin, Cout) — PyTorch's (Cout, Cin, K)
    transposed so each tap is a (Cin, Cout) matmul.  The Linear weight is
    pre-transposed to (64, num_classes)."""
    ks = jax.random.split(key, 8)
    w1 = 0.1 * jax.random.normal(ks[0], (3, input_channels, 16), jnp.float32)
    b1 = 0.1 * jax.random.normal(ks[1], (1, 16), jnp.float32)
    w2 = 0.1 * jax.random.normal(ks[2], (3, 16, 32), jnp.float32)
    b2 = 0.1 * jax.random.normal(ks[3], (1, 32), jnp.float32)
    w3 = 0.1 * jax.random.normal(ks[4], (3, 32, 64), jnp.float32)
    b3 = 0.1 * jax.random.normal(ks[5], (1, 64), jnp.float32)
    fcw = 0.1 * jax.random.normal(ks[6], (64, num_classes), jnp.float32)
    fcb = 0.1 * jax.random.normal(ks[7], (1, num_classes), jnp.float32)
    return (w1, b1), (w2, b2), (w3, b3), (fcw, fcb)


def reference_forward(signals, params):
    """Plain-JAX reference for AggregateModel with identical math."""
    (w1, b1), (w2, b2), (w3, b3), (fcw, fcb) = params
    B, N, Cin, L = signals.shape
    x = jnp.transpose(signals.reshape(B * N, Cin, L), (0, 2, 1))  # (B*N, L, Cin)

    def conv(x, w, b):
        Lx = x.shape[1]
        xp = jnp.pad(x, ((0, 0), (1, 1), (0, 0)))
        y = sum(jnp.einsum('blc,cd->bld', xp[:, k:k + Lx, :], w[k]) for k in range(3))
        return jax.nn.relu(y + b[None, :, :])

    h = conv(x, w1, b1)
    h = conv(h, w2, b2)
    h = conv(h, w3, b3)
    pooled = jnp.mean(h, axis=1)                                  # (B*N, 64)
    logits = pooled @ fcw + fcb                                   # (B*N, nc)
    return jnp.mean(logits.reshape(B, N, -1), axis=1)             # (B, nc)


if __name__ == "__main__":
    key = jax.random.PRNGKey(0)
    k_x, k_p = jax.random.split(key)

    B, N_SIG, C_IN, L, NUM_CLASSES = 2, 4, 16, 16, 32
    signals = jax.random.normal(k_x, (B, N_SIG, C_IN, L), jnp.float32)  # PyTorch layout
    params = init_params(k_p, C_IN, NUM_CLASSES)

    ref = jax.block_until_ready(reference_forward(signals, params))

    # Exact f32 path.
    out = jax.block_until_ready(aggregate_forward(signals, params))
    assert out.shape == (B, NUM_CLASSES)
    assert jnp.allclose(out, ref, atol=1e-4, rtol=1e-4), "f32 kernel mismatch vs JAX reference"

    # Optional bf16-operand path (f32 accumulation): looser tolerance by design.
    out_bf16 = jax.block_until_ready(aggregate_forward(signals, params, use_bf16=True))
    assert out_bf16.shape == (B, NUM_CLASSES)
    assert jnp.allclose(out_bf16, ref, atol=5e-2, rtol=5e-2), "bf16 kernel mismatch vs JAX reference"

    print("KERNEL_OK")
</pallas_src>

<mosaic_0001>
module attributes {stable_mosaic.version = 11 : i64} {
  func.func @kernel(%arg0: i32, %arg1: memref<2x64x16xf32, #tpu.memory_space<vmem>>, %arg2: memref<3x16x16xf32, #tpu.memory_space<vmem>>, %arg3: memref<1x16xf32, #tpu.memory_space<vmem>>, %arg4: memref<3x16x32xf32, #tpu.memory_space<vmem>>, %arg5: memref<1x32xf32, #tpu.memory_space<vmem>>, %arg6: memref<3x32x64xf32, #tpu.memory_space<vmem>>, %arg7: memref<1x64xf32, #tpu.memory_space<vmem>>, %arg8: memref<64x32xf32, #tpu.memory_space<vmem>>, %arg9: memref<1x32xf32, #tpu.memory_space<vmem>>, %arg10: memref<2x32xf32, #tpu.memory_space<vmem>>) attributes {dimension_semantics = [#tpu.dimension_semantics<parallel>], iteration_bounds = array<i64: 1>, scalar_prefetch = 0 : i64, scratch_operands = 0 : i64, tpu.core_type = #tpu.core_type<tc>, window_params = [{transform_indices = @transform_0, window_bounds = array<i64: 2, 64, 16>}, {pipeline_mode = #tpu.pipeline_mode<synchronous>, transform_indices = @transform_1, window_bounds = array<i64: 3, 16, 16>}, {pipeline_mode = #tpu.pipeline_mode<synchronous>, transform_indices = @transform_2, window_bounds = array<i64: 1, 16>}, {pipeline_mode = #tpu.pipeline_mode<synchronous>, transform_indices = @transform_3, window_bounds = array<i64: 3, 16, 32>}, {pipeline_mode = #tpu.pipeline_mode<synchronous>, transform_indices = @transform_4, window_bounds = array<i64: 1, 32>}, {pipeline_mode = #tpu.pipeline_mode<synchronous>, transform_indices = @transform_5, window_bounds = array<i64: 3, 32, 64>}, {pipeline_mode = #tpu.pipeline_mode<synchronous>, transform_indices = @transform_6, window_bounds = array<i64: 1, 64>}, {pipeline_mode = #tpu.pipeline_mode<synchronous>, transform_indices = @transform_7, window_bounds = array<i64: 64, 32>}, {pipeline_mode = #tpu.pipeline_mode<synchronous>, transform_indices = @transform_8, window_bounds = array<i64: 1, 32>}, {transform_indices = @transform_9, window_bounds = array<i64: 2, 32>}]} {
    %c0 = arith.constant 0 : index
    %c0_0 = arith.constant 0 : index
    %c0_1 = arith.constant 0 : index
    %0 = vector.load %arg1[%c0, %c0_0, %c0_1] : memref<2x64x16xf32, #tpu.memory_space<vmem>>, vector<2x64x16xf32>
    %1 = vector.shape_cast %0 : vector<2x64x16xf32> to vector<128x16xf32>
    %2 = tpu.iota {dimensions = array<i32: 0>} : vector<128x1xi32>
    %c16_i32 = arith.constant 16 : i32
    %c0_i32 = arith.constant 0 : i32
    %3 = arith.cmpi eq, %c16_i32, %c0_i32 : i32
    %c1_i32 = arith.constant 1 : i32
    %4 = arith.select %3, %c1_i32, %c16_i32 : i32
    %5 = vector.broadcast %4 : i32 to vector<128x1xi32>
    %6 = arith.remsi %2, %5 : vector<128x1xi32>
    %c0_i32_2 = arith.constant 0 : i32
    %7 = vector.broadcast %c0_i32_2 : i32 to vector<128x1xi32>
    %8 = arith.cmpi ne, %6, %7 : vector<128x1xi32>
    %c0_i32_3 = arith.constant 0 : i32
    %9 = vector.broadcast %c0_i32_3 : i32 to vector<128x1xi32>
    %10 = arith.cmpi slt, %6, %9 : vector<128x1xi32>
    %c0_i32_4 = arith.constant 0 : i32
    %11 = arith.cmpi slt, %4, %c0_i32_4 : i32
    %12 = vector.broadcast %11 : i1 to vector<128x1xi1>
    %13 = vector.broadcast %12 : vector<128x1xi1> to vector<128x1xi1>
    %14 = arith.xori %10, %13 : vector<128x1xi1>
    %15 = arith.andi %14, %8 : vector<128x1xi1>
    %16 = vector.broadcast %4 : i32 to vector<128x1xi32>
    %17 = arith.addi %6, %16 : vector<128x1xi32>
    %18 = arith.select %15, %17, %6 : vector<128x1xi1>, vector<128x1xi32>
    %c0_i32_5 = arith.constant 0 : i32
    %19 = vector.broadcast %c0_i32_5 : i32 to vector<128x1xi32>
    %20 = arith.cmpi eq, %18, %19 : vector<128x1xi32>
    %c15_i32 = arith.constant 15 : i32
    %21 = vector.broadcast %c15_i32 : i32 to vector<128x1xi32>
    %22 = arith.cmpi eq, %18, %21 : vector<128x1xi32>
    %c1_i32_6 = arith.constant 1 : i32
    %23 = tpu.dynamic_rotate %1 by %c1_i32_6 dim 0 : vector<128x16xf32>, i32 -> vector<128x16xf32>
    %cst = arith.constant 0.000000e+00 : f32
    %24 = vector.shape_cast %20 : vector<128x1xi1> to vector<128x1xi1>
    %25 = vector.broadcast %24 : vector<128x1xi1> to vector<128x16xi1>
    %26 = vector.broadcast %cst : f32 to vector<128x16xf32>
    %27 = arith.select %25, %26, %23 : vector<128x16xi1>, vector<128x16xf32>
    %c127_i32 = arith.constant 127 : i32
    %28 = tpu.dynamic_rotate %1 by %c127_i32 dim 0 : vector<128x16xf32>, i32 -> vector<128x16xf32>
    %cst_7 = arith.constant 0.000000e+00 : f32
    %29 = vector.shape_cast %22 : vector<128x1xi1> to vector<128x1xi1>
    %30 = vector.broadcast %29 : vector<128x1xi1> to vector<128x16xi1>
    %31 = vector.broadcast %cst_7 : f32 to vector<128x16xf32>
    %32 = arith.select %30, %31, %28 : vector<128x16xi1>, vector<128x16xf32>
    %c1 = arith.constant 1 : index
    %c0_8 = arith.constant 0 : index
    %c0_9 = arith.constant 0 : index
    %33 = vector.load %arg2[%c1, %c0_8, %c0_9] : memref<3x16x16xf32, #tpu.memory_space<vmem>>, vector<1x16x16xf32>
    %34 = vector.shape_cast %33 : vector<1x16x16xf32> to vector<16x16xf32>
    %cst_10 = arith.constant dense<0.000000e+00> : vector<128x16xf32>
    %35 = tpu.matmul %1, %34, %cst_10 {dimension_numbers = #tpu.dot_dimension_numbers<[1], [0], [0], [1], [0, 0, 1, 1], [], []>} : vector<128x16xf32>, vector<16x16xf32>, vector<128x16xf32> -> vector<128x16xf32>
    %c0_11 = arith.constant 0 : index
    %c0_12 = arith.constant 0 : index
    %c0_13 = arith.constant 0 : index
    %36 = vector.load %arg2[%c0_11, %c0_12, %c0_13] : memref<3x16x16xf32, #tpu.memory_space<vmem>>, vector<1x16x16xf32>
    %37 = vector.shape_cast %36 : vector<1x16x16xf32> to vector<16x16xf32>
    %cst_14 = arith.constant dense<0.000000e+00> : vector<128x16xf32>
    %38 = tpu.matmul %27, %37, %cst_14 {dimension_numbers = #tpu.dot_dimension_numbers<[1], [0], [0], [1], [0, 0, 1, 1], [], []>} : vector<128x16xf32>, vector<16x16xf32>, vector<128x16xf32> -> vector<128x16xf32>
    %39 = arith.addf %35, %38 : vector<128x16xf32>
    %c2 = arith.constant 2 : index
    %c0_15 = arith.constant 0 : index
    %c0_16 = arith.constant 0 : index
    %40 = vector.load %arg2[%c2, %c0_15, %c0_16] : memref<3x16x16xf32, #tpu.memory_space<vmem>>, vector<1x16x16xf32>
    %41 = vector.shape_cast %40 : vector<1x16x16xf32> to vector<16x16xf32>
    %cst_17 = arith.constant dense<0.000000e+00> : vector<128x16xf32>
    %42 = tpu.matmul %32, %41, %cst_17 {dimension_numbers = #tpu.dot_dimension_numbers<[1], [0], [0], [1], [0, 0, 1, 1], [], []>} : vector<128x16xf32>, vector<16x16xf32>, vector<128x16xf32> -> vector<128x16xf32>
    %43 = arith.addf %39, %42 : vector<128x16xf32>
    %c0_18 = arith.constant 0 : index
    %c0_19 = arith.constant 0 : index
    %44 = vector.load %arg3[%c0_18, %c0_19] : memref<1x16xf32, #tpu.memory_space<vmem>>, vector<1x16xf32>
    %45 = vector.broadcast %44 : vector<1x16xf32> to vector<128x16xf32>
    %46 = arith.addf %43, %45 : vector<128x16xf32>
    %cst_20 = arith.constant 0.000000e+00 : f32
    %47 = vector.broadcast %cst_20 : f32 to vector<128x16xf32>
    %48 = arith.maximumf %46, %47 : vector<128x16xf32>
    %c1_i32_21 = arith.constant 1 : i32
    %49 = tpu.dynamic_rotate %48 by %c1_i32_21 dim 0 : vector<128x16xf32>, i32 -> vector<128x16xf32>
    %cst_22 = arith.constant 0.000000e+00 : f32
    %50 = vector.shape_cast %20 : vector<128x1xi1> to vector<128x1xi1>
    %51 = vector.broadcast %50 : vector<128x1xi1> to vector<128x16xi1>
    %52 = vector.broadcast %cst_22 : f32 to vector<128x16xf32>
    %53 = arith.select %51, %52, %49 : vector<128x16xi1>, vector<128x16xf32>
    %c127_i32_23 = arith.constant 127 : i32
    %54 = tpu.dynamic_rotate %48 by %c127_i32_23 dim 0 : vector<128x16xf32>, i32 -> vector<128x16xf32>
    %cst_24 = arith.constant 0.000000e+00 : f32
    %55 = vector.shape_cast %22 : vector<128x1xi1> to vector<128x1xi1>
    %56 = vector.broadcast %55 : vector<128x1xi1> to vector<128x16xi1>
    %57 = vector.broadcast %cst_24 : f32 to vector<128x16xf32>
    %58 = arith.select %56, %57, %54 : vector<128x16xi1>, vector<128x16xf32>
    %c1_25 = arith.constant 1 : index
    %c0_26 = arith.constant 0 : index
    %c0_27 = arith.constant 0 : index
    %59 = vector.load %arg4[%c1_25, %c0_26, %c0_27] : memref<3x16x32xf32, #tpu.memory_space<vmem>>, vector<1x16x32xf32>
    %60 = vector.shape_cast %59 : vector<1x16x32xf32> to vector<16x32xf32>
    %cst_28 = arith.constant dense<0.000000e+00> : vector<128x32xf32>
    %61 = tpu.matmul %48, %60, %cst_28 {dimension_numbers = #tpu.dot_dimension_numbers<[1], [0], [0], [1], [0, 0, 1, 1], [], []>} : vector<128x16xf32>, vector<16x32xf32>, vector<128x32xf32> -> vector<128x32xf32>
    %c0_29 = arith.constant 0 : index
    %c0_30 = arith.constant 0 : index
    %c0_31 = arith.constant 0 : index
    %62 = vector.load %arg4[%c0_29, %c0_30, %c0_31] : memref<3x16x32xf32, #tpu.memory_space<vmem>>, vector<1x16x32xf32>
    %63 = vector.shape_cast %62 : vector<1x16x32xf32> to vector<16x32xf32>
    %cst_32 = arith.constant dense<0.000000e+00> : vector<128x32xf32>
    %64 = tpu.matmul %53, %63, %cst_32 {dimension_numbers = #tpu.dot_dimension_numbers<[1], [0], [0], [1], [0, 0, 1, 1], [], []>} : vector<128x16xf32>, vector<16x32xf32>, vector<128x32xf32> -> vector<128x32xf32>
    %65 = arith.addf %61, %64 : vector<128x32xf32>
    %c2_33 = arith.constant 2 : index
    %c0_34 = arith.constant 0 : index
    %c0_35 = arith.constant 0 : index
    %66 = vector.load %arg4[%c2_33, %c0_34, %c0_35] : memref<3x16x32xf32, #tpu.memory_space<vmem>>, vector<1x16x32xf32>
    %67 = vector.shape_cast %66 : vector<1x16x32xf32> to vector<16x32xf32>
    %cst_36 = arith.constant dense<0.000000e+00> : vector<128x32xf32>
    %68 = tpu.matmul %58, %67, %cst_36 {dimension_numbers = #tpu.dot_dimension_numbers<[1], [0], [0], [1], [0, 0, 1, 1], [], []>} : vector<128x16xf32>, vector<16x32xf32>, vector<128x32xf32> -> vector<128x32xf32>
    %69 = arith.addf %65, %68 : vector<128x32xf32>
    %c0_37 = arith.constant 0 : index
    %c0_38 = arith.constant 0 : index
    %70 = vector.load %arg5[%c0_37, %c0_38] : memref<1x32xf32, #tpu.memory_space<vmem>>, vector<1x32xf32>
    %71 = vector.broadcast %70 : vector<1x32xf32> to vector<128x32xf32>
    %72 = arith.addf %69, %71 : vector<128x32xf32>
    %cst_39 = arith.constant 0.000000e+00 : f32
    %73 = vector.broadcast %cst_39 : f32 to vector<128x32xf32>
    %74 = arith.maximumf %72, %73 : vector<128x32xf32>
    %c1_i32_40 = arith.constant 1 : i32
    %75 = tpu.dynamic_rotate %74 by %c1_i32_40 dim 0 : vector<128x32xf32>, i32 -> vector<128x32xf32>
    %cst_41 = arith.constant 0.000000e+00 : f32
    %76 = vector.shape_cast %20 : vector<128x1xi1> to vector<128x1xi1>
    %77 = vector.broadcast %76 : vector<128x1xi1> to vector<128x32xi1>
    %78 = vector.broadcast %cst_41 : f32 to vector<128x32xf32>
    %79 = arith.select %77, %78, %75 : vector<128x32xi1>, vector<128x32xf32>
    %c127_i32_42 = arith.constant 127 : i32
    %80 = tpu.dynamic_rotate %74 by %c127_i32_42 dim 0 : vector<128x32xf32>, i32 -> vector<128x32xf32>
    %cst_43 = arith.constant 0.000000e+00 : f32
    %81 = vector.shape_cast %22 : vector<128x1xi1> to vector<128x1xi1>
    %82 = vector.broadcast %81 : vector<128x1xi1> to vector<128x32xi1>
    %83 = vector.broadcast %cst_43 : f32 to vector<128x32xf32>
    %84 = arith.select %82, %83, %80 : vector<128x32xi1>, vector<128x32xf32>
    %c1_44 = arith.constant 1 : index
    %c0_45 = arith.constant 0 : index
    %c0_46 = arith.constant 0 : index
    %85 = vector.load %arg6[%c1_44, %c0_45, %c0_46] : memref<3x32x64xf32, #tpu.memory_space<vmem>>, vector<1x32x64xf32>
    %86 = vector.shape_cast %85 : vector<1x32x64xf32> to vector<32x64xf32>
    %cst_47 = arith.constant dense<0.000000e+00> : vector<128x64xf32>
    %87 = tpu.matmul %74, %86, %cst_47 {dimension_numbers = #tpu.dot_dimension_numbers<[1], [0], [0], [1], [0, 0, 1, 1], [], []>} : vector<128x32xf32>, vector<32x64xf32>, vector<128x64xf32> -> vector<128x64xf32>
    %c0_48 = arith.constant 0 : index
    %c0_49 = arith.constant 0 : index
    %c0_50 = arith.constant 0 : index
    %88 = vector.load %arg6[%c0_48, %c0_49, %c0_50] : memref<3x32x64xf32, #tpu.memory_space<vmem>>, vector<1x32x64xf32>
    %89 = vector.shape_cast %88 : vector<1x32x64xf32> to vector<32x64xf32>
    %cst_51 = arith.constant dense<0.000000e+00> : vector<128x64xf32>
    %90 = tpu.matmul %79, %89, %cst_51 {dimension_numbers = #tpu.dot_dimension_numbers<[1], [0], [0], [1], [0, 0, 1, 1], [], []>} : vector<128x32xf32>, vector<32x64xf32>, vector<128x64xf32> -> vector<128x64xf32>
    %91 = arith.addf %87, %90 : vector<128x64xf32>
    %c2_52 = arith.constant 2 : index
    %c0_53 = arith.constant 0 : index
    %c0_54 = arith.constant 0 : index
    %92 = vector.load %arg6[%c2_52, %c0_53, %c0_54] : memref<3x32x64xf32, #tpu.memory_space<vmem>>, vector<1x32x64xf32>
    %93 = vector.shape_cast %92 : vector<1x32x64xf32> to vector<32x64xf32>
    %cst_55 = arith.constant dense<0.000000e+00> : vector<128x64xf32>
    %94 = tpu.matmul %84, %93, %cst_55 {dimension_numbers = #tpu.dot_dimension_numbers<[1], [0], [0], [1], [0, 0, 1, 1], [], []>} : vector<128x32xf32>, vector<32x64xf32>, vector<128x64xf32> -> vector<128x64xf32>
    %95 = arith.addf %91, %94 : vector<128x64xf32>
    %c0_56 = arith.constant 0 : index
    %c0_57 = arith.constant 0 : index
    %96 = vector.load %arg7[%c0_56, %c0_57] : memref<1x64xf32, #tpu.memory_space<vmem>>, vector<1x64xf32>
    %97 = vector.broadcast %96 : vector<1x64xf32> to vector<128x64xf32>
    %98 = arith.addf %95, %97 : vector<128x64xf32>
    %cst_58 = arith.constant 0.000000e+00 : f32
    %99 = vector.broadcast %cst_58 : f32 to vector<128x64xf32>
    %100 = arith.maximumf %98, %99 : vector<128x64xf32>
    %101 = vector.shape_cast %100 : vector<128x64xf32> to vector<2x64x64xf32>
    %cst_59 = arith.constant dense<0.000000e+00> : vector<2x64xf32>
    %102 = vector.multi_reduction <add>, %101, %cst_59 [1] : vector<2x64x64xf32> to vector<2x64xf32>
    %cst_60 = arith.constant 1.562500e-02 : f32
    %103 = vector.broadcast %cst_60 : f32 to vector<2x64xf32>
    %104 = arith.mulf %102, %103 : vector<2x64xf32>
    %c0_61 = arith.constant 0 : index
    %c0_62 = arith.constant 0 : index
    %105 = vector.load %arg8[%c0_61, %c0_62] : memref<64x32xf32, #tpu.memory_space<vmem>>, vector<64x32xf32>
    %cst_63 = arith.constant dense<0.000000e+00> : vector<2x32xf32>
    %106 = tpu.matmul %104, %105, %cst_63 {dimension_numbers = #tpu.dot_dimension_numbers<[1], [0], [0], [1], [0, 0, 1, 1], [], []>} : vector<2x64xf32>, vector<64x32xf32>, vector<2x32xf32> -> vector<2x32xf32>
    %c0_64 = arith.constant 0 : index
    %c0_65 = arith.constant 0 : index
    %107 = vector.load %arg9[%c0_64, %c0_65] : memref<1x32xf32, #tpu.memory_space<vmem>>, vector<1x32xf32>
    %108 = vector.broadcast %107 : vector<1x32xf32> to vector<2x32xf32>
    %109 = arith.addf %106, %108 : vector<2x32xf32>
    %c0_66 = arith.constant 0 : index
    %c0_67 = arith.constant 0 : index
    %110 = vector.load %arg10[%c0_66, %c0_67] : memref<2x32xf32, #tpu.memory_space<vmem>>, vector<2x32xf32>
    tpu.vector_store %arg10[%c0_66, %c0_67], %109 {strides = array<i32>} : memref<2x32xf32, #tpu.memory_space<vmem>>, vector<2x32xf32>,
    return
  }
  func.func @transform_0(%arg0: i32) -> (i32, i32, i32) {
    %c0_i32 = arith.constant 0 : i32
    %c0_i32_0 = arith.constant 0 : i32
    %c0_i32_1 = arith.constant 0 : i32
    return %arg0, %c0_i32, %c0_i32_0 : i32, i32, i32
  }
  func.func @transform_1(%arg0: i32) -> (i32, i32, i32) {
    %c0_i32 = arith.constant 0 : i32
    %c0_i32_0 = arith.constant 0 : i32
    %c0_i32_1 = arith.constant 0 : i32
    %c0_i32_2 = arith.constant 0 : i32
    return %c0_i32, %c0_i32_0, %c0_i32_1 : i32, i32, i32
  }
  func.func @transform_2(%arg0: i32) -> (i32, i32) {
    %c0_i32 = arith.constant 0 : i32
    %c0_i32_0 = arith.constant 0 : i32
    %c0_i32_1 = arith.constant 0 : i32
    return %c0_i32, %c0_i32_0 : i32, i32
  }
  func.func @transform_3(%arg0: i32) -> (i32, i32, i32) {
    %c0_i32 = arith.constant 0 : i32
    %c0_i32_0 = arith.constant 0 : i32
    %c0_i32_1 = arith.constant 0 : i32
    %c0_i32_2 = arith.constant 0 : i32
    return %c0_i32, %c0_i32_0, %c0_i32_1 : i32, i32, i32
  }
  func.func @transform_4(%arg0: i32) -> (i32, i32) {
    %c0_i32 = arith.constant 0 : i32
    %c0_i32_0 = arith.constant 0 : i32
    %c0_i32_1 = arith.constant 0 : i32
    return %c0_i32, %c0_i32_0 : i32, i32
  }
  func.func @transform_5(%arg0: i32) -> (i32, i32, i32) {
    %c0_i32 = arith.constant 0 : i32
    %c0_i32_0 = arith.constant 0 : i32
    %c0_i32_1 = arith.constant 0 : i32
    %c0_i32_2 = arith.constant 0 : i32
    return %c0_i32, %c0_i32_0, %c0_i32_1 : i32, i32, i32
  }
  func.func @transform_6(%arg0: i32) -> (i32, i32) {
    %c0_i32 = arith.constant 0 : i32
    %c0_i32_0 = arith.constant 0 : i32
    %c0_i32_1 = arith.constant 0 : i32
    return %c0_i32, %c0_i32_0 : i32, i32
  }
  func.func @transform_7(%arg0: i32) -> (i32, i32) {
    %c0_i32 = arith.constant 0 : i32
    %c0_i32_0 = arith.constant 0 : i32
    %c0_i32_1 = arith.constant 0 : i32
    return %c0_i32, %c0_i32_0 : i32, i32
  }
  func.func @transform_8(%arg0: i32) -> (i32, i32) {
    %c0_i32 = arith.constant 0 : i32
    %c0_i32_0 = arith.constant 0 : i32
    %c0_i32_1 = arith.constant 0 : i32
    return %c0_i32, %c0_i32_0 : i32, i32
  }
  func.func @transform_9(%arg0: i32) -> (i32, i32) {
    %c0_i32 = arith.constant 0 : i32
    %c0_i32_0 = arith.constant 0 : i32
    return %arg0, %c0_i32 : i32, i32
  }
}

</mosaic_0001>

<bundles_post_ra>
// kernel: tpu_custom_call.1
= control target key start
LH: loop header
LB: loop body
LE: loop exit
PB: predicated region body
PF: predicated region fallthrough
CT: control target
= control target key end

     0   :  { %vm4771_vm0 = vcmask 130048   ;;  %v49_v3 = vlaneseq  ;;  %s4756_s0 = inlined_call_operand.vmem [shape: f32[2,64,16], index: 0, kind: input, shape index: {}]   ;;  %s4757_s1 = inlined_call_operand.vmem [shape: f32[3,16,16], index: 1, kind: input, shape index: {}]   ;;  %s4758_s2 = inlined_call_operand.vmem [shape: f32[1,16], index: 2, kind: input, shape index: {}]   ;;  %s4759_s3 = inlined_call_operand.vmem [shape: f32[3,16,32], index: 3, kind: input, shape index: {}]   ;;  %s4760_s4 = inlined_call_operand.vmem [shape: f32[1,32], index: 4, kind: input, shape index: {}]   ;;  %s4761_s5 = inlined_call_operand.vmem [shape: f32[3,32,64], index: 5, kind: input, shape index: {}]   ;;  %s4762_s6 = inlined_call_operand.vmem [shape: f32[1,64], index: 6, kind: input, shape index: {}]   ;;  %s4763_s7 = inlined_call_operand.vmem [shape: f32[64,32], index: 7, kind: input, shape index: {}]   ;;  %s4764_s8 = inlined_call_operand.vmem [shape: f32[1,32], index: 8, kind: input, shape index: {}]   ;;  %s4765_s9 = inlined_call_operand.hbm [shape: f32[2,32], index: 9, kind: output, shape index: {}]  }
   0x1   :  { %v2730_v0 = vld [vmem:[%s4757_s1 + $0x10] sm:$0xff]  ;;  %v2731_v1 = vld [vmem:[%s4757_s1 + $0x18] sm:$0xff]  ;;  %v455_v2 = vld [vmem:[%s4757_s1] sm:$0xff] }
   0x2   :  { %v3359_v4 = vpack.c.bf16 %v2731_v1, %v2730_v0  ;;  %v456_v5 = vld [vmem:[%s4757_s1 + $0x8] sm:$0xff]  ;;  %v3610_v6 = vld [vmem:[%s4756_s0] sm:$0xff]  ;;  %v3630_v13 = vld [vmem:[%s4756_s0 + $0x78] sm:$0xff]  ;;  %v3632_v15 = vshrl.u32 %v49_v3, 7 }
   0x3   :  { %v3615_v7 = vld [vmem:[%s4756_s0 + $0x8] sm:$0xff]  ;;  %v3355_v8 = vpack.c.bf16 %v456_v5, %v455_v2  ;;  %v290_v9 = vrot.slane %v3610_v6, 7  ;;  %3104 = vmatprep.mubr.msk.f32.mxu0 %vm4771_vm0, %v3610_v6  ;;  %v2764_v11 = vld [vmem:[%s4757_s1 + $0x20] sm:$0xff]  ;;  %v305_v16 = vrot.slane %v3630_v13, 7  ;;  %v3638_v17 = vld [vmem:[%s4756_s0 + $0x10] sm:$0xff] }
   0x4   :  { %v291_v10 = vrot.slane %v3615_v7, 7  ;;  %v2765_v12 = vld [vmem:[%s4757_s1 + $0x28] sm:$0xff]  ;;  %3360 = vmatprep.subr.bf16.mxu0 %v3359_v4  ;;  %v3643_v18 = vld [vmem:[%s4756_s0 + $0x18] sm:$0xff]  ;;  %v292_v19 = vrot.slane %v3638_v17, 7  ;;  %v3649_v20 = vld [vmem:[%s4756_s0 + $0x20] sm:$0xff]  ;;  %v70_v21 = vand.u32 15, %v3632_v15 }
   0x5   :  { %v3363_v14 = vpack.c.bf16 %v2765_v12, %v2764_v11  ;;  %3362 = vmatpush3.bf16.msra.mxu0 %v3359_v4  ;;  %3356 = vmatprep.subr.bf16.mxu1 %v3355_v8  ;;  %vm4766_vm1 = vcmp.lt.s32.totalorder %v3632_v15, 1  ;;  %v52_v22 = vadd.s32 16, %v3632_v15  ;;  %v293_v25 = vrot.slane %v3643_v18, 7  ;;  %v3664_v26 = vld [vmem:[%s4756_s0 + $0x30] sm:$0xff]  ;;  %v3682_v32 = vld [vmem:[%s4756_s0 + $0x28] sm:$0xff]  ;;  %v3694_v36 = vld [vmem:[%s4756_s0 + $0x40] sm:$0xff] }
   0x6   :  { %3358 = vmatpush3.bf16.msra.mxu1 %v3355_v8  ;;  %v322_v23 = vsel %vm4766_vm1, %v305_v16, %v290_v9  ;;  %v321_v24 = vsel %vm4766_vm1, %v290_v9, %v291_v10  ;;  %vm3668_vm2 = vcmp.eq.s32.totalorder %v70_v21, 0  ;;  %v320_v29 = vsel %vm4766_vm1, %v291_v10, %v292_v19 }
   0x7   :  { %3364 = vmatprep.subr.bf16.mxu0 %v3363_v14  ;;  %3415 = vmatprep.subr.bf16.mxu1 %v3359_v4  ;;  %v84_v28 = vand.u32 15, %v52_v22  ;;  %v294_v30 = vrot.slane %v3649_v20, 7  ;;  %v355_v31 = vsel %vm3668_vm2, 0.0, %v322_v23  ;;  %v54_v33 = vadd.s32 32, %v3632_v15 }
   0x8   :  { %3105 = vmatmul.mubr.msk.f32.vlgmr.msra.gmra.mrb[0].mxu0 %vm4771_vm0, %v3615_v7  ;;  %3076 = vmatprep.mubr.msk.f32.mxu1 %vm4771_vm0, %v355_v31  ;;  %v296_v35 = vrot.slane %v3664_v26, 7 }
   0x9   :  { %3366 = vmatpush3.bf16.msra.mxu0 %v3363_v14  ;;  %3107 = vmatprep.mubr.msk.f32.mxu0 %vm4771_vm0, %v3638_v17  ;;  %vm3686_vm3 = vcmp.eq.s32.totalorder %v84_v28, 0 }
   0xa   :  { %14 = vsyncpa [#allocation3], 0  ;;  %3077 = vmatmul.mubr.msk.f32.vlgmr.msra.gmra.mrb[0].mxu1 %vm4771_vm0, %v321_v24  ;;  %v357_v37 = vsel %vm3686_vm3, 0.0, %v320_v29  ;;  %v98_v38 = vand.u32 15, %v54_v33  ;;  %v318_v39 = vsel %vm4766_vm1, %v293_v25, %v294_v30  ;;  %v319_v40 = vsel %vm4766_vm1, %v292_v19, %v293_v25  ;;  %v3710_v42 = vld [vmem:[%s4756_s0 + $0x38] sm:$0xff]  ;;  %v3734_v55 = vld [vmem:[%s4756_s0 + $0x50] sm:$0xff] }
   0xb   :  { %3079 = vmatprep.mubr.msk.f32.mxu1 %vm4771_vm0, %v357_v37  ;;  %v295_v41 = vrot.slane %v3682_v32, 7  ;;  %v56_v43 = vadd.s32 48, %v3632_v15  ;;  %v371_v44 = vrot.slane %v3610_v6, 1  ;;  %v4799_v45 = vmov 0  ;;  %3416 = vmatpush3.bf16.msra.mxu1 %v3359_v4  ;;  %v3748_v58 = vld [vmem:[%s4756_s0 + $0x48] sm:$0xff]  ;;  %v3767_v4 = vld [vmem:[%s4756_s0 + $0x60] sm:$0xff] }
   0xc   :  { %3108 = vmatmul.mubr.msk.f32.gmra.mrb[2].mxu0 %vm4771_vm0, %v3643_v18  ;;  %vm3716_vm4 = vcmp.eq.s32.totalorder %v98_v38, 0  ;;  %v298_v46 = vrot.slane %v3694_v36, 7  ;;  %v58_v50 = vadd.s32 64, %v3632_v15  ;;  %v372_v51 = vrot.slane %v3615_v7, 1  ;;  %v3786_v14 = vld [vmem:[%s4756_s0 + $0x58] sm:$0xff]  ;;  %v3815_v31 = vld [vmem:[%s4756_s0 + $0x70] sm:$0xff] }
   0xd   :  { %3110 = vmatprep.mubr.msk.f32.mxu0 %vm4771_vm0, %v3649_v20  ;;  %v4800_v45 = vsel %vm3716_vm4, 4294967295, %v4799_v45  ;;  %v359_v47 = vsel %vm3716_vm4, 0.0, %v318_v39  ;;  %v112_v48 = vand.u32 15, %v56_v43  ;;  %v316_v49 = vsel %vm4766_vm1, %v295_v41, %v296_v35  ;;  %v1195_v6 = vld [vmem:[%s4759_s3 + $0x8] sm:$0xff]  ;;  %v2875_v43 = vld [vmem:[%s4761_s5 + $0x58] sm:$0xff]  ;;  %s3544_s13 = smov [#allocation2]  }
   0xe   :  { %v373_v52 = vrot.slane %v3638_v17, 1  ;;  %3080 = vmatmul.mubr.msk.f32.gmra.mrb[2].mxu1 %vm4771_vm0, %v319_v40  ;;  %v297_v53 = vrot.slane %v3710_v42, 7  ;;  %v51_v54 = vadd.s32 8, %v3632_v15  ;;  %v317_v56 = vsel %vm4766_vm1, %v294_v30, %v295_v41  ;;  %v3839_v40 = vld [vmem:[%s4756_s0 + $0x68] sm:$0xff]  ;;  %s2722_s14 = sshll.u32 %s3544_s13, 4  ;;  %s2723_s14 = int_to_ptr.vmem [resolvable:$true] %s2722_s14 }
   0xf   :  { %3082 = vmatprep.mubr.msk.f32.mxu1 %vm4771_vm0, %v359_v47  ;;  %vm3741_vm5 = vcmp.eq.s32.totalorder %v112_v48, 0  ;;  %v126_v59 = vand.u32 15, %v58_v50  ;;  %v60_v60 = vadd.s32 80, %v3632_v15  ;;  %vm4772_vm6 = vcmp.lt.s32.totalorder %v3632_v15, 7  ;;  %v2873_v27 = vld [vmem:[%s4761_s5 + $0x48] sm:$0xff]  ;;  %s3517_s15 = scalar_lea.vmem %s2723_s14, 32  ;;  %p3522_p1 = scmp.lt.s32.totalorder %s2723_s14, %s2723_s14 }
  0x10   :  { %3111 = vmatmul.mubr.msk.f32.gmra.mrb[4].mxu0 %vm4771_vm0, %v3682_v32  ;;  %v361_v61 = vsel %vm3741_vm5, 0.0, %v316_v49  ;;  %v314_v62 = vsel %vm4766_vm1, %v297_v53, %v298_v46  ;;  %v77_v63 = vand.u32 15, %v51_v54  ;;  %v300_v2 = vrot.slane %v3734_v55, 7  ;;  %p3518_p0 = scmp.ne.s32.totalorder %s2723_s14, %s3517_s15  ;;  %p3523_p2 = scmp.lt.s32.totalorder %s3517_s15, %s3517_s15 }
  0x11   :  { %3113 = vmatprep.mubr.msk.f32.mxu0 %vm4771_vm0, %v3664_v26  ;;  %vm3758_vm7 = vcmp.eq.s32.totalorder %v126_v59, 0  ;;  %v140_v1 = vand.u32 15, %v60_v60  ;;  %v53_v3 = vadd.s32 24, %v3632_v15  ;;  %v374_v5 = vrot.slane %v3643_v18, 1 }
  0x12   :  { %v375_v7 = vrot.slane %v3649_v20, 1  ;;  %3083 = vmatmul.mubr.msk.f32.gmra.mrb[4].mxu1 %vm4771_vm0, %v317_v56  ;;  %v299_v8 = vrot.slane %v3748_v58, 7  ;;  %v376_v9 = vrot.slane %v3682_v32, 1  ;;  %v315_v10 = vsel %vm4766_vm1, %v296_v35, %v297_v53  ;;  %p3524_p3 = por %p3523_p2, %p3522_p1 }
  0x13   :  { %3085 = vmatprep.mubr.msk.f32.mxu1 %vm4771_vm0, %v361_v61  ;;  %v363_v11 = vsel %vm3758_vm7, 0.0, %v314_v62  ;;  %v401_v12 = vsel %vm4772_vm6, %v372_v51, %v373_v52  ;;  %vm3790_vm8 = vcmp.eq.s32.totalorder %v77_v63, 15  ;;  %v91_v18 = vand.u32 15, %v53_v3 }
  0x14   :  { %3114 = vmatmul.mubr.msk.f32.gmra.mrb[6].mxu0 %vm4771_vm0, %v3710_v42  ;;  %v62_v19 = vadd.s32 96, %v3632_v15  ;;  %v302_v20 = vrot.slane %v3767_v4, 7  ;;  %v402_v21 = vsel %vm4772_vm6, %v371_v44, %v372_v51  ;;  %vm3800_vm9 = vcmp.eq.s32.totalorder %v140_v1, 0  ;;  %p3525_p4 = pnand %p3524_p3, %p3518_p0 }
  0x15   :  { %3116 = vmatprep.mubr.msk.f32.mxu0 %vm4771_vm0, %v3694_v36  ;;  %v4807_v22 = vmov 0  ;;  %v312_v23 = vsel %vm4766_vm1, %v299_v8, %v300_v2  ;;  %v55_v24 = vadd.s32 40, %v3632_v15  ;;  %v377_v25 = vrot.slane %v3664_v26, 1 }
  0x16   :  { %v4808_v22 = vsel %vm3800_vm9, 4294967295, %v4807_v22  ;;  %3086 = vmatmul.mubr.msk.f32.gmra.mrb[6].mxu1 %vm4771_vm0, %v315_v10  ;;  %v313_v28 = vsel %vm4766_vm1, %v298_v46, %v299_v8  ;;  %v301_v29 = vrot.slane %v3786_v14, 7  ;;  %v154_v30 = vand.u32 15, %v62_v19 }
  0x17   :  { %3088 = vmatprep.mubr.msk.f32.mxu1 %vm4771_vm0, %v363_v11  ;;  %v437_v26 = vsel %vm3790_vm8, 0.0, %v401_v12  ;;  %v400_v32 = vsel %vm4772_vm6, %v373_v52, %v374_v5  ;;  %v399_v33 = vsel %vm4772_vm6, %v374_v5, %v375_v7  ;;  %v64_v35 = vadd.s32 112, %v3632_v15 }
  0x18   :  { %3117 = vmatmul.mubr.msk.f32.gmra.mrb[8].mxu0 %vm4771_vm0, %v3748_v58  ;;  %v365_v37 = vsel %vm3800_vm9, 0.0, %v312_v23  ;;  %vm3830_vm10 = vcmp.eq.s32.totalorder %v91_v18, 15  ;;  %v310_v39 = vsel %vm4766_vm1, %v301_v29, %v302_v20  ;;  %v105_v41 = vand.u32 15, %v55_v24 }
  0x19   :  { %3132 = vmatprep.mubr.msk.f32.mxu0 %vm4771_vm0, %v402_v21  ;;  %vm3841_vm11 = vcmp.eq.s32.totalorder %v154_v30, 0  ;;  %v168_v46 = vand.u32 15, %v64_v35  ;;  %v304_v47 = vrot.slane %v3815_v31, 7  ;;  %v57_v48 = vadd.s32 56, %v3632_v15 }
  0x1a   :  { %v378_v49 = vrot.slane %v3710_v42, 1  ;;  %3089 = vmatmul.mubr.msk.f32.gmra.mrb[8].mxu1 %vm4771_vm0, %v313_v28  ;;  %v379_v50 = vrot.slane %v3694_v36, 1  ;;  %v311_v51 = vsel %vm4766_vm1, %v300_v2, %v301_v29  ;;  %v303_v52 = vrot.slane %v3839_v40, 7 }
  0x1b   :  { %3091 = vmatprep.mubr.msk.f32.mxu1 %vm4771_vm0, %v365_v37  ;;  %v398_v53 = vsel %vm4772_vm6, %v375_v7, %v376_v9  ;;  %v439_v42 = vsel %vm3830_vm10, 0.0, %v399_v33  ;;  %v367_v36 = vsel %vm3841_vm11, 0.0, %v310_v39  ;;  %vm3862_vm12 = vcmp.eq.s32.totalorder %v105_v41, 15 }
  0x1c   :  { %3133 = vmatmul.mubr.msk.f32.vlgmr.msra.gmra.mrb[0].mxu0 %vm4771_vm0, %v437_v26  ;;  %v397_v56 = vsel %vm4772_vm6, %v376_v9, %v377_v25  ;;  %vm3868_vm13 = vcmp.eq.s32.totalorder %v168_v46, 0  ;;  %v308_v60 = vsel %vm4766_vm1, %v303_v52, %v304_v47  ;;  %v119_v61 = vand.u32 15, %v57_v48 }
  0x1d   :  { %3135 = vmatprep.mubr.msk.f32.mxu0 %vm4771_vm0, %v400_v32  ;;  %v59_v62 = vadd.s32 72, %v3632_v15  ;;  %v380_v63 = vrot.slane %v3748_v58, 1  ;;  %v309_v1 = vsel %vm4766_vm1, %v302_v20, %v303_v52  ;;  %v441_v2 = vsel %vm3862_vm12, 0.0, %v397_v56 }
  0x1e   :  { %3092 = vmatmul.mubr.msk.f32.gmra.mrb[10].mxu1 %vm4771_vm0, %v311_v51  ;;  %v369_v3 = vsel %vm3868_vm13, 0.0, %v308_v60  ;;  %v396_v5 = vsel %vm4772_vm6, %v377_v25, %v378_v49  ;;  %v395_v58 = vsel %vm4772_vm6, %v378_v49, %v379_v50  ;;  %vm3890_vm14 = vcmp.eq.s32.totalorder %v119_v61, 15  ;;  %v1194_v49 = vld [vmem:[%s4759_s3] sm:$0xff] }
  0x1f   :  { %3094 = vmatprep.mubr.msk.f32.mxu1 %vm4771_vm0, %v367_v36  ;;  %v4817_v7 = vmov 0  ;;  %v133_v8 = vand.u32 15, %v59_v62  ;;  %v381_v9 = vrot.slane %v3734_v55, 1  ;;  %v61_v10 = vadd.s32 88, %v3632_v15 }
  0x20   :  { %3136 = vmatmul.mubr.msk.f32.gmra.mrb[2].mxu0 %vm4771_vm0, %v439_v42  ;;  %v4818_v7 = vsel %vm3890_vm14, 4294967295, %v4817_v7  ;;  %v307_v11 = vsel %vm4766_vm1, %v304_v47, %v305_v16  ;;  %v443_v12 = vsel %vm3890_vm14, 0.0, %v395_v58  ;;  %v394_v18 = vsel %vm4772_vm6, %v379_v50, %v380_v63  ;;  %v2784_v50 = vld [vmem:[%s4759_s3 + $0x18] sm:$0xff] }
  0x21   :  { %3138 = vmatprep.mubr.msk.f32.mxu0 %vm4771_vm0, %v398_v53  ;;  %4819 = vst [vmem:[#allocation5_spill] sm:$0xff] %v4818_v7  ;;  %v382_v19 = vrot.slane %v3786_v14, 1  ;;  %v383_v20 = vrot.slane %v3767_v4, 1  ;;  %vm3910_vm15 = vcmp.eq.s32.totalorder %v133_v8, 15  ;;  %v4820_v21 = vmov 0 }
  0x22   :  { %3095 = vmatmul.mubr.msk.f32.gmra.mrb[12].mxu1 %vm4771_vm0, %v309_v1  ;;  %v4821_v21 = vsel %vm3910_vm15, 4294967295, %v4820_v21  ;;  %v393_v23 = vsel %vm4772_vm6, %v380_v63, %v381_v9  ;;  %v147_v16 = vand.u32 15, %v61_v10  ;;  %v63_v24 = vadd.s32 104, %v3632_v15 }
  0x23   :  { %3097 = vmatprep.mubr.msk.f32.mxu1 %vm4771_vm0, %v369_v3  ;;  %4822 = vst [vmem:[#allocation6_spill] sm:$0xff] %v4821_v21  ;;  %v445_v25 = vsel %vm3910_vm15, 0.0, %v393_v23  ;;  %v392_v28 = vsel %vm4772_vm6, %v381_v9, %v382_v19  ;;  %v391_v29 = vsel %vm4772_vm6, %v382_v19, %v383_v20  ;;  %v384_v30 = vrot.slane %v3839_v40, 1 }
  0x24   :  { %3139 = vmatmul.mubr.msk.f32.gmra.mrb[4].mxu0 %vm4771_vm0, %v441_v2  ;;  %vm3929_vm1 = vcmp.eq.s32.totalorder %v147_v16, 15  ;;  %v4823_v26 = vmov 0  ;;  %v161_v32 = vand.u32 15, %v63_v24  ;;  %v65_v33 = vadd.s32 120, %v3632_v15  ;;  %v3995_v2 = vld [vmem:[%s4758_s2] ss:$0 sm:$0xff] }
  0x25   :  { %3141 = vmatprep.mubr.msk.f32.mxu0 %vm4771_vm0, %v396_v5  ;;  %v4824_v26 = vsel %vm3929_vm1, 4294967295, %v4823_v26  ;;  %v447_v35 = vsel %vm3929_vm1, 0.0, %v391_v29  ;;  %v386_v37 = vrot.slane %v3630_v13, 1  ;;  %v390_v39 = vsel %vm4772_vm6, %v383_v20, %v384_v30 }
  0x26   :  { %3098 = vmatmul.mubr.msk.f32.gmra.mrb[14].mxu1 %vm4771_vm0, %v307_v11  ;;  %4825 = vst [vmem:[#allocation7_spill] sm:$0xff] %v4824_v26  ;;  %vm3946_vm15 = vcmp.eq.s32.totalorder %v161_v32, 15  ;;  %v4826_v41 = vmov 0  ;;  %v175_v46 = vand.u32 15, %v65_v33  ;;  %v4829_v48 = vmov 0 }
  0x27   :  { %3119 = vmatprep.mubr.msk.f32.mxu1 %vm4771_vm0, %v3734_v55  ;;  %v385_v55 = vrot.slane %v3815_v31, 1  ;;  %v4827_v41 = vsel %vm3946_vm15, 4294967295, %v4826_v41 }
  0x28   :  { %3142 = vmatmul.mubr.msk.f32.gmra.mrb[6].mxu0 %vm4771_vm0, %v443_v12  ;;  %4828 = vst [vmem:[#allocation8_spill] sm:$0xff] %v4827_v41  ;;  %vm3962_vm1 = vcmp.eq.s32.totalorder %v175_v46, 15 }
  0x29   :  { %3144 = vmatprep.mubr.msk.f32.mxu0 %vm4771_vm0, %v394_v18  ;;  %v388_v47 = vsel %vm4772_vm6, %v385_v55, %v386_v37  ;;  %v4830_v48 = vsel %vm3962_vm1, 4294967295, %v4829_v48 }
  0x2a   :  { %3120 = vmatmul.mubr.msk.f32.vlgmr.msra.gmra.mrb[10].mxu1 %vm4771_vm0, %v3786_v14  ;;  %v389_v14 = vsel %vm4772_vm6, %v384_v30, %v385_v55  ;;  %4831 = vst [vmem:[#allocation9_spill] sm:$0xff] %v4830_v48 }
  0x2b   :  { %3122 = vmatprep.mubr.msk.f32.mxu1 %vm4771_vm0, %v3767_v4  ;;  %v449_v4 = vsel %vm3946_vm15, 0.0, %v389_v14 }
  0x2c   :  { %3145 = vmatmul.mubr.msk.f32.gmra.mrb[8].mxu0 %vm4771_vm0, %v445_v25 }
  0x2d   :  { %3147 = vmatprep.mubr.msk.f32.mxu0 %vm4771_vm0, %v392_v28 }
  0x2e   :  { %3123 = vmatmul.mubr.msk.f32.gmra.mrb[12].mxu1 %vm4771_vm0, %v3839_v40  ;;  %v403_v40 = vsel %vm4772_vm6, %v386_v37, %v371_v44  ;;  %v3367_v44 = vpack.c.bf16 %v1195_v6, %v1194_v49 }
  0x2f   :  { %3125 = vmatprep.mubr.msk.f32.mxu1 %vm4771_vm0, %v3815_v31  ;;  %v451_v31 = vsel %vm3962_vm1, 0.0, %v403_v40  ;;  %vm4836_vm1 = vcmp.lt.s32.totalorder %v3632_v15, 1 }
  0x30   :  { %3148 = vmatmul.mubr.msk.f32.gmra.mrb[10].mxu0 %vm4771_vm0, %v447_v35  ;;  %3368 = vmatprep.subr.bf16.mxu1 %v3367_v44 }
  0x31   :  { %3150 = vmatprep.mubr.msk.f32.mxu0 %vm4771_vm0, %v390_v39  ;;  %3370 = vmatpush3.bf16.msra.mxu1 %v3367_v44 }
  0x32   :  { %3126 = vmatmul.mubr.msk.f32.gmra.mrb[14].mxu1 %vm4771_vm0, %v3630_v13  ;;  %v2783_v13 = vld [vmem:[%s4759_s3 + $0x10] sm:$0xff] }
  0x33   :  { %v3989_v51 = vpack.c.bf16 %v2784_v50, %v2783_v13 }
  0x34   :  { %3151 = vmatmul.mubr.msk.f32.gmra.mrb[12].mxu0 %vm4771_vm0, %v449_v4 }
  0x35   :  { %3153 = vmatprep.mubr.msk.f32.mxu0 %vm4771_vm0, %v388_v47  ;;  %3372 = vmatprep.subr.bf16.mxu1 %v3989_v51 }
  0x38   :  { %3154 = vmatmul.mubr.msk.f32.gmra.mrb[14].mxu0 %vm4771_vm0, %v451_v31  ;;  %vm4832_vm0 = vcmp.lt.s32.totalorder %v3632_v15, 1 }
  0xdd   :  { %v3078_v52 = vpop.f32.mrb[0].mxu1 }
  0xde   :  { %v572_v53 = vpop.f32.mrb[1].mxu1 }
  0xe1   :  { %v3081_v42 = vpop.f32.mrb[2].mxu1 }
  0xe2   :  { %v582_v36 = vpop.f32.mrb[3].mxu1 }
  0xe5   :  { %v3084_v56 = vpop.f32.mrb[4].mxu1 }
  0xe6   :  { %v592_v60 = vpop.f32.mrb[5].mxu1 }
  0xe9   :  { %v3087_v61 = vpop.f32.mrb[6].mxu1 }
  0xea   :  { %v602_v62 = vpop.f32.mrb[7].mxu1 }
  0xed   :  { %v3090_v63 = vpop.f32.mrb[8].mxu1 }
  0xee   :  { %v612_v3 = vpop.f32.mrb[9].mxu1 }
  0xef   :  { %v3134_v1 = vpop.f32.mrb[0].mxu0 }
  0xf0   :  { %v3417_v5 = vadd.f32 %v3134_v1, %v3078_v52  ;;  %v961_v58 = vpop.f32.mrb[1].mxu0 }
  0xf1   :  { %v3418_v8 = vadd.f32 %v961_v58, %v572_v53 }
  0xf2   :  { %v1064_v9 = vadd.f32 %v3417_v5, %v3995_v2 }
  0xf3   :  { %v1063_v10 = vadd.f32 %v3418_v8, %v3995_v2  ;;  %v3137_v11 = vpop.f32.mrb[2].mxu0 }
  0xf4   :  { %v3999_v12 = vmax.f32 %v1064_v9, 0.0  ;;  %v3419_v18 = vadd.f32 %v3137_v11, %v3081_v42  ;;  %v971_v19 = vpop.f32.mrb[3].mxu0 }
  0xf5   :  { %v4001_v20 = vmax.f32 %v1063_v10, 0.0  ;;  %v3420_v23 = vadd.f32 %v971_v19, %v582_v36 }
  0xf6   :  { %v1096_v16 = vrot.slane %v3999_v12, 7  ;;  %v1144_v24 = vrot.slane %v3999_v12, 1  ;;  %v1066_v25 = vadd.f32 %v3419_v18, %v3995_v2 }
  0xf7   :  { %v4776_v28 = vrot.slane %v4001_v20, 7  ;;  %v4775_v29 = vrot.slane %v4001_v20, 1  ;;  %v1065_v30 = vadd.f32 %v3420_v23, %v3995_v2  ;;  %v3140_v32 = vpop.f32.mrb[4].mxu0 }
  0xf8   :  { %v4009_v55 = vmax.f32 %v1066_v25, 0.0  ;;  %v3421_v33 = vadd.f32 %v3140_v32, %v3084_v56  ;;  %v981_v35 = vpop.f32.mrb[5].mxu0 }
  0xf9   :  { %v4011_v37 = vmax.f32 %v1065_v30, 0.0  ;;  %v3422_v39 = vadd.f32 %v981_v35, %v592_v60  ;;  %v4017_v14 = vsel %vm4832_vm0, %v4776_v28, %v1096_v16  ;;  %v4023_v46 = vsel %vm4772_vm6, %v4775_v29, %v1144_v24  ;;  %vm4833_vm6 = vmmov %vm4832_vm0 }
  0xfa   :  { %v1098_v4 = vrot.slane %v4009_v55, 7  ;;  %v1068_v47 = vadd.f32 %v3421_v33, %v3995_v2  ;;  %v1146_v44 = vrot.slane %v4009_v55, 1 }
  0xfb   :  { %v1097_v40 = vrot.slane %v4011_v37, 7  ;;  %v1145_v31 = vrot.slane %v4011_v37, 1  ;;  %v1067_v49 = vadd.f32 %v3422_v39, %v3995_v2  ;;  %v3143_v6 = vpop.f32.mrb[6].mxu0 }
  0xfc   :  { %v4031_v13 = vmax.f32 %v1068_v47, 0.0  ;;  %v3423_v50 = vadd.f32 %v3143_v6, %v3087_v61  ;;  %v991_v52 = vpop.f32.mrb[7].mxu0 }
  0xfd   :  { %v4033_v53 = vmax.f32 %v1067_v49, 0.0  ;;  %v3424_v42 = vadd.f32 %v991_v52, %v602_v62  ;;  %v4037_v36 = vsel %vm4832_vm0, %v1096_v16, %v1097_v40  ;;  %v4041_v56 = vsel %vm4833_vm6, %v1097_v40, %v1098_v4  ;;  %v3121_v5 = vpop.f32.mrb[10].mxu1 }
  0xfe   :  { %v1100_v60 = vrot.slane %v4031_v13, 7  ;;  %v1070_v1 = vadd.f32 %v3423_v50, %v3995_v2  ;;  %v815_v62 = vpop.f32.mrb[11].mxu1  ;;  %vm4834_vm0 = vcmp.lt.s32.totalorder %v3632_v15, 7  ;;  %v1148_v11 = vrot.slane %v4031_v13, 1 }
  0xff   :  { %v1099_v58 = vrot.slane %v4033_v53, 7  ;;  %v1147_v61 = vrot.slane %v4033_v53, 1  ;;  %v1069_v8 = vadd.f32 %v3424_v42, %v3995_v2  ;;  %v3146_v9 = vpop.f32.mrb[8].mxu0  ;;  %v4050_v10 = vsel %vm4834_vm0, %v1144_v24, %v1145_v31  ;;  %vm4835_vm6 = vmmov %vm4834_vm0 }
 0x100   :  { %v4053_v18 = vmax.f32 %v1070_v1, 0.0  ;;  %v3425_v19 = vadd.f32 %v3146_v9, %v3090_v63  ;;  %v1001_v23 = vpop.f32.mrb[9].mxu0  ;;  %v4057_v16 = vsel %vm4835_vm6, %v1145_v31, %v1146_v44  ;;  %vm4837_vm0 = vmmov %vm4836_vm1 }
 0x101   :  { %v4059_v25 = vmax.f32 %v1069_v8, 0.0  ;;  %v3426_v30 = vadd.f32 %v1001_v23, %v612_v3  ;;  %v4063_v32 = vsel %vm4836_vm1, %v1098_v4, %v1099_v58  ;;  %v4067_v24 = vsel %vm4837_vm0, %v1099_v58, %v1100_v60  ;;  %v3124_v35 = vpop.f32.mrb[12].mxu1  ;;  %vm4838_vm1 = vmmov %vm4835_vm6 }
 0x102   :  { %v1102_v33 = vrot.slane %v4053_v18, 7  ;;  %v1072_v63 = vadd.f32 %v3425_v19, %v3995_v2  ;;  %v825_v3 = vpop.f32.mrb[13].mxu1  ;;  %v4076_v4 = vsel %vm4838_vm1, %v1146_v44, %v1147_v61  ;;  %v1150_v49 = vrot.slane %v4053_v18, 1  ;;  %vm4839_vm6 = vmmov %vm4838_vm1 }
 0x103   :  { %v1101_v39 = vrot.slane %v4059_v25, 7  ;;  %v1149_v47 = vrot.slane %v4059_v25, 1  ;;  %v1071_v40 = vadd.f32 %v3426_v30, %v3995_v2  ;;  %v3149_v31 = vpop.f32.mrb[10].mxu0  ;;  %v4083_v42 = vsel %vm4839_vm6, %v1147_v61, %v1148_v11  ;;  %vm4840_vm1 = vmmov %vm4837_vm0 }
 0x104   :  { %v4079_v6 = vmax.f32 %v1072_v63, 0.0  ;;  %v3427_v50 = vadd.f32 %v3149_v31, %v3121_v5  ;;  %v1011_v52 = vpop.f32.mrb[11].mxu0  ;;  %vm4842_vm15 = vmmov %vm4840_vm1 }
 0x105   :  { %v4085_v1 = vmax.f32 %v1071_v40, 0.0  ;;  %v3428_v58 = vadd.f32 %v1011_v52, %v815_v62  ;;  %v4089_v8 = vsel %vm4837_vm0, %v1100_v60, %v1101_v39  ;;  %v4093_v44 = vsel %vm4840_vm1, %v1101_v39, %v1102_v33  ;;  %v3127_v19 = vpop.f32.mrb[14].mxu1  ;;  %vm4841_vm0 = vmmov %vm4839_vm6 }
 0x106   :  { %v1104_v9 = vrot.slane %v4079_v6, 7  ;;  %v1074_v5 = vadd.f32 %v3427_v50, %v3995_v2  ;;  %v835_v62 = vpop.f32.mrb[15].mxu1  ;;  %v4102_v60 = vsel %vm4839_vm6, %v1148_v11, %v1149_v47  ;;  %v1152_v39 = vrot.slane %v4079_v6, 1  ;;  %vm4843_vm6 = vmmov %vm4841_vm0 }
 0x107   :  { %v1103_v23 = vrot.slane %v4085_v1, 7  ;;  %v1151_v61 = vrot.slane %v4085_v1, 1  ;;  %v1073_v30 = vadd.f32 %v3428_v58, %v3995_v2  ;;  %v3152_v63 = vpop.f32.mrb[12].mxu0  ;;  %v4109_v50 = vsel %vm4841_vm0, %v1149_v47, %v1150_v49  ;;  %vm4853_vm14 = vmmov %vm4843_vm6 }
 0x108   :  { %v4105_v40 = vmax.f32 %v1074_v5, 0.0  ;;  %v3429_v31 = vadd.f32 %v3152_v63, %v3124_v35  ;;  %v1021_v52 = vpop.f32.mrb[13].mxu0 }
 0x109   :  { %v4111_v29 = vmax.f32 %v1073_v30, 0.0  ;;  %v3430_v28 = vadd.f32 %v1021_v52, %v825_v3  ;;  %v1118_v58 = vsel %vm4840_vm1, %v1102_v33, %v1103_v23  ;;  %v1117_v11 = vsel %vm4842_vm15, %v1103_v23, %v1104_v9  ;;  %vm4845_vm15 = vmmov %vm4841_vm0 }
 0x10a   :  { %v1106_v48 = vrot.slane %v4105_v40, 7  ;;  %v1076_v5 = vadd.f32 %v3429_v31, %v3995_v2  ;;  %v4124_v3 = vsel %vm4843_vm6, %v1150_v49, %v1151_v61  ;;  %v1154_v33 = vrot.slane %v4105_v40, 1  ;;  %vm4847_vm0 = vmmov %vm4840_vm1 }
 0x10b   :  { %v1105_v35 = vrot.slane %v4111_v29, 7  ;;  %v1153_v63 = vrot.slane %v4111_v29, 1  ;;  %v1075_v47 = vadd.f32 %v3430_v28, %v3995_v2  ;;  %v3155_v41 = vpop.f32.mrb[14].mxu0  ;;  %4844 = vst [vmem:[#allocation10_spill] sm:$0xff] %v4124_v3  ;;  %v4131_v31 = vsel %vm4845_vm15, %v1151_v61, %v1152_v39  ;;  %vm4848_vm1 = vmmov %vm4847_vm0 }
 0x10c   :  { %v4127_v30 = vmax.f32 %v1076_v5, 0.0  ;;  %v3431_v23 = vadd.f32 %v3155_v41, %v3127_v19  ;;  %v1031_v52 = vpop.f32.mrb[15].mxu0  ;;  %4846 = vst [vmem:[#allocation11_spill] sm:$0xff] %v4131_v31  ;;  %vm4850_vm15 = vmmov %vm4843_vm6 }
 0x10d   :  { %v4133_v26 = vmax.f32 %v1075_v47, 0.0  ;;  %v3432_v21 = vadd.f32 %v1031_v52, %v835_v62  ;;  %v1116_v28 = vsel %vm4847_vm0, %v1104_v9, %v1105_v35  ;;  %v1115_v49 = vsel %vm4848_vm1, %v1105_v35, %v1106_v48  ;;  %vm4852_vm1 = vmmov %vm4847_vm0 }
 0x10e   :  { %v1108_v7 = vrot.slane %v4127_v30, 7  ;;  %v1156_v5 = vrot.slane %v4127_v30, 1  ;;  %v1078_v41 = vadd.f32 %v3431_v23, %v3995_v2  ;;  %v4147_v62 = vsel %vm4843_vm6, %v1152_v39, %v1153_v63  ;;  %v2817_v39 = vld [vmem:[%s4759_s3 + $0x20] sm:$0xff] }
 0x10f   :  { %v1107_v19 = vrot.slane %v4133_v26, 7  ;;  %v1155_v61 = vrot.slane %v4133_v26, 1  ;;  %v1077_v47 = vadd.f32 %v3432_v21, %v3995_v2  ;;  %4849 = vst [vmem:[#allocation12_spill] sm:$0xff] %v4147_v62  ;;  %v4153_v35 = vsel %vm4850_vm15, %v1153_v63, %v1154_v33  ;;  %v2818_v63 = vld [vmem:[%s4759_s3 + $0x28] sm:$0xff]  ;;  %vm4857_vm15 = vmmov %vm4847_vm0 }
 0x110   :  { %v4149_v9 = vmax.f32 %v1078_v41, 0.0  ;;  %4851 = vst [vmem:[#allocation13_spill] sm:$0xff] %v4153_v35  ;;  %v3375_v62 = vpack.c.bf16 %v2818_v63, %v2817_v39 }
 0x111   :  { %v4155_v52 = vmax.f32 %v1077_v47, 0.0  ;;  %v1114_v23 = vsel %vm4847_vm0, %v1106_v48, %v1107_v19  ;;  %v1113_v31 = vsel %vm4852_vm1, %v1107_v19, %v1108_v7  ;;  %v4163_v21 = vsel %vm4853_vm14, %v1154_v33, %v1155_v61  ;;  %vm4856_vm14 = vmmov %vm4847_vm0 }
 0x112   :  { %4854 = vst [vmem:[#allocation14_spill] sm:$0xff] %v4163_v21  ;;  %v1110_v2 = vrot.slane %v4149_v9, 7  ;;  %v4176_v19 = vsel %vm4843_vm6, %v1155_v61, %v1156_v5  ;;  %v4855_v33 = vrot.slane %v4001_v20, 7  ;;  %vm4858_vm0 = vmmov %vm4843_vm6  ;;  %vm4859_vm1 = vcmask 130048  }
 0x113   :  { %v1109_v41 = vrot.slane %v4155_v52, 7  ;;  %v1157_v48 = vrot.slane %v4155_v52, 1  ;;  %vm4860_vm6 = vmmov %vm4859_vm1  ;;  %v1129_v61 = vsel %vm3686_vm3, 0.0, %v4037_v36  ;;  %v1137_v36 = vsel %vm3800_vm9, 0.0, %v1116_v28 }
 0x114   :  { %v1126_v47 = vsel %vm4856_vm14, %v1110_v2, %v4855_v33  ;;  %vm4861_vm14 = vmmov %vm4859_vm1 }
 0x115   :  { %v1127_v21 = vsel %vm3668_vm2, 0.0, %v1126_v47  ;;  %v1112_v35 = vsel %vm4857_vm15, %v1108_v7, %v1109_v41  ;;  %v4190_v3 = vsel %vm4858_vm0, %v1156_v5, %v1157_v48  ;;  %vm4862_vm15 = vmmov %vm4859_vm1  ;;  %v1131_v7 = vsel %vm3716_vm4, 0.0, %v4063_v32  ;;  %v2837_v5 = vld [vmem:[%s4761_s5 + $0x28] sm:$0xff] }
 0x116   :  { %3160 = vmatprep.mubr.msk.f32.mxu1 %vm4859_vm1, %v1127_v21  ;;  %vm4863_vm0 = vmmov %vm4859_vm1  ;;  %v1141_v32 = vsel %vm3868_vm13, 0.0, %v1112_v35 }
 0x117   :  { %3161 = vmatmul.mubr.msk.f32.vlgmr.msra.gmra.mrb[16].mxu1 %vm4860_vm6, %v4017_v14  ;;  %vm4864_vm1 = vmmov %vm4863_vm0  ;;  %v1133_v14 = vsel %vm3741_vm5, 0.0, %v4089_v8 }
 0x118   :  { %3163 = vmatprep.mubr.msk.f32.mxu1 %vm4861_vm14, %v1129_v61  ;;  %3374 = vmatpush3.bf16.msra.mxu1 %v3989_v51  ;;  %vm4865_vm6 = vmmov %vm4863_vm0  ;;  %v1135_v51 = vsel %vm3758_vm7, 0.0, %v1118_v58 }
 0x119   :  { %3376 = vmatprep.subr.bf16.mxu1 %v3375_v62  ;;  %vm4866_vm14 = vmmov %vm4863_vm0 }
 0x11a   :  { %vm4868_vm4 = vmmov %vm4863_vm0 }
 0x11b   :  { %3164 = vmatmul.mubr.msk.f32.gmra.mrb[18].mxu1 %vm4862_vm15, %v4041_v56  ;;  %vm4867_vm15 = vmmov %vm4863_vm0  ;;  %v1139_v56 = vsel %vm3841_vm11, 0.0, %v1114_v23 }
 0x11c   :  { %3166 = vmatprep.mubr.msk.f32.mxu1 %vm4863_vm0, %v1131_v7  ;;  %vm4874_vm9 = vmmov %vm4863_vm0 }
 0x11f   :  { %3167 = vmatmul.mubr.msk.f32.gmra.mrb[20].mxu1 %vm4864_vm1, %v4067_v24  ;;  %vm4869_vm1 = vmmov %vm4863_vm0 }
 0x120   :  { %3169 = vmatprep.mubr.msk.f32.mxu1 %vm4865_vm6, %v1133_v14  ;;  %vm4870_vm6 = vmmov %vm4863_vm0 }
 0x123   :  { %3170 = vmatmul.mubr.msk.f32.gmra.mrb[22].mxu1 %vm4866_vm14, %v4093_v44  ;;  %vm4871_vm14 = vmmov %vm4863_vm0 }
 0x124   :  { %3172 = vmatprep.mubr.msk.f32.mxu1 %vm4867_vm15, %v1135_v51  ;;  %vm4872_vm15 = vmmov %vm4863_vm0 }
 0x127   :  { %3173 = vmatmul.mubr.msk.f32.gmra.mrb[24].mxu1 %vm4868_vm4, %v1117_v11  ;;  %vm4873_vm4 = vcmp.lt.s32.totalorder %v3632_v15, 1  ;;  %v1934_v11 = vld [vmem:[%s4761_s5] sm:$0xff] }
 0x128   :  { %3175 = vmatprep.mubr.msk.f32.mxu1 %vm4863_vm0, %v1137_v36  ;;  %v1111_v24 = vsel %vm4873_vm4, %v1109_v41, %v1110_v2  ;;  %vm4879_vm4 = vmmov %vm4863_vm0 }
 0x12b   :  { %3176 = vmatmul.mubr.msk.f32.gmra.mrb[26].mxu1 %vm4869_vm1, %v1115_v49  ;;  %vm4875_vm1 = vmmov %vm4863_vm0  ;;  %v2836_v49 = vld [vmem:[%s4761_s5 + $0x20] sm:$0xff] }
 0x12c   :  { %3178 = vmatprep.mubr.msk.f32.mxu1 %vm4870_vm6, %v1139_v56  ;;  %vm4876_vm6 = vmmov %vm4863_vm0 }
 0x12f   :  { %3179 = vmatmul.mubr.msk.f32.gmra.mrb[28].mxu1 %vm4871_vm14, %v1113_v31  ;;  %vm4877_vm14 = vmmov %vm4863_vm0  ;;  %v1937_v31 = vld [vmem:[%s4761_s5 + $0x18] sm:$0xff] }
 0x130   :  { %3181 = vmatprep.mubr.msk.f32.mxu1 %vm4872_vm15, %v1141_v32  ;;  %vm4878_vm15 = vmmov %vm4863_vm0 }
 0x133   :  { %3182 = vmatmul.mubr.msk.f32.gmra.mrb[30].mxu1 %vm4874_vm9, %v1111_v24  ;;  %vm4880_vm9 = vmmov %vm4863_vm0 }
 0x134   :  { %3188 = vmatprep.mubr.msk.f32.mxu1 %vm4863_vm0, %v4001_v20 }
 0x137   :  { %3189 = vmatmul.mubr.msk.f32.vlgmr.msra.gmra.mrb[16].mxu1 %vm4875_vm1, %v3999_v12  ;;  %vm4881_vm1 = vmmov %vm4863_vm0  ;;  %v1176_v12 = vsel %vm3790_vm8, 0.0, %v4050_v10  ;;  %v4901_v10 = vld [vmem:[#allocation6_spill] sm:$0xff] }
 0x138   :  { %3191 = vmatprep.mubr.msk.f32.mxu1 %vm4876_vm6, %v4011_v37  ;;  %3378 = vmatpush3.bf16.msra.mxu1 %v3375_v62  ;;  %vm4882_vm6 = vmmov %vm4863_vm0  ;;  %v4895_v37 = vld [vmem:[#allocation5_spill] sm:$0xff]  ;;  %v4337_v62 = vpack.c.bf16 %v2837_v5, %v2836_v49 }
 0x13b   :  { %3192 = vmatmul.mubr.msk.f32.gmra.mrb[18].mxu1 %vm4877_vm14, %v4009_v55  ;;  %vm4883_vm14 = vmmov %vm4863_vm0  ;;  %v4894_v55 = vld [vmem:[#allocation10_spill] sm:$0xff] }
 0x13c   :  { %3194 = vmatprep.mubr.msk.f32.mxu1 %vm4878_vm15, %v4033_v53  ;;  %vm4884_vm15 = vmmov %vm4863_vm0  ;;  %v4900_v53 = vld [vmem:[#allocation12_spill] sm:$0xff] }
 0x13f   :  { %3195 = vmatmul.mubr.msk.f32.gmra.mrb[20].mxu1 %vm4879_vm4, %v4031_v13  ;;  %vm4885_vm4 = vmmov %vm4863_vm0  ;;  %v4898_v13 = vld [vmem:[#allocation11_spill] sm:$0xff] }
 0x140   :  { %3197 = vmatprep.mubr.msk.f32.mxu1 %vm4880_vm9, %v4059_v25  ;;  %vm4886_vm9 = vmmov %vm4863_vm0  ;;  %v4905_v25 = vld [vmem:[#allocation14_spill] sm:$0xff] }
 0x143   :  { %3198 = vmatmul.mubr.msk.f32.gmra.mrb[22].mxu1 %vm4863_vm0, %v4053_v18 }
 0x144   :  { %3200 = vmatprep.mubr.msk.f32.mxu1 %vm4881_vm1, %v4085_v1  ;;  %vm4887_vm1 = vmmov %vm4863_vm0  ;;  %v4910_v1 = vld [vmem:[#allocation8_spill] sm:$0xff] }
 0x147   :  { %3201 = vmatmul.mubr.msk.f32.gmra.mrb[24].mxu1 %vm4882_vm6, %v4079_v6  ;;  %vm4888_vm6 = vmmov %vm4863_vm0 }
 0x148   :  { %3203 = vmatprep.mubr.msk.f32.mxu1 %vm4883_vm14, %v4111_v29  ;;  %vm4889_vm14 = vmmov %vm4863_vm0  ;;  %v1180_v29 = vsel %vm3862_vm12, 0.0, %v4102_v60  ;;  %v4914_v60 = vrot.slane %v4001_v20, 1  ;;  %v1936_v20 = vld [vmem:[%s4761_s5 + $0x10] sm:$0xff] }
 0x149   :  { %v3383_v28 = vpack.c.bf16 %v1937_v31, %v1936_v20 }
 0x14b   :  { %3204 = vmatmul.mubr.msk.f32.gmra.mrb[26].mxu1 %vm4884_vm15, %v4105_v40  ;;  %vm4890_vm15 = vmmov %vm4863_vm0 }
 0x14c   :  { %3206 = vmatprep.mubr.msk.f32.mxu1 %vm4885_vm4, %v4133_v26  ;;  %v1178_v26 = vsel %vm3830_vm10, 0.0, %v4076_v4  ;;  %vm4891_vm4 = vmmov %vm4863_vm0  ;;  %v4906_v4 = vld [vmem:[#allocation7_spill] sm:$0xff] }
 0x14f   :  { %3207 = vmatmul.mubr.msk.f32.gmra.mrb[28].mxu1 %vm4886_vm9, %v4127_v30  ;;  %vm4892_vm9 = vmmov %vm4863_vm0 }
 0x150   :  { %3209 = vmatprep.mubr.msk.f32.mxu1 %vm4863_vm0, %v4155_v52 }
 0x153   :  { %3210 = vmatmul.mubr.msk.f32.gmra.mrb[30].mxu1 %vm4887_vm1, %v4149_v9  ;;  %vm4893_vm1 = vmmov %vm4863_vm0 }
 0x154   :  { %3216 = vmatprep.mubr.msk.f32.mxu1 %vm4888_vm6, %v4023_v46  ;;  %vm4896_vm6 = vnez %v4895_v37 }
 0x155   :  { %v1182_v46 = vsel %vm4896_vm6, 0.0, %v4894_v55  ;;  %vm4908_vm6 = vmmov %vm4863_vm0 }
 0x157   :  { %3217 = vmatmul.mubr.msk.f32.vlgmr.msra.gmra.mrb[16].mxu1 %vm4889_vm14, %v1176_v12  ;;  %vm4897_vm14 = vmmov %vm4863_vm0 }
 0x158   :  { %3219 = vmatprep.mubr.msk.f32.mxu1 %vm4890_vm15, %v4057_v16  ;;  %vm4899_vm15 = vmmov %vm4863_vm0  ;;  %v4904_v16 = vld [vmem:[#allocation13_spill] sm:$0xff] }
 0x15b   :  { %3220 = vmatmul.mubr.msk.f32.gmra.mrb[18].mxu1 %vm4891_vm4, %v1178_v26  ;;  %vm4902_vm4 = vnez %v4901_v10 }
 0x15c   :  { %3222 = vmatprep.mubr.msk.f32.mxu1 %vm4892_vm9, %v4083_v42  ;;  %v1184_v18 = vsel %vm4902_vm4, 0.0, %v4900_v53  ;;  %vm4903_vm9 = vmmov %vm4863_vm0  ;;  %v1158_v42 = vrot.slane %v4149_v9, 1  ;;  %v4343_v9 = vld [vmem:[%s4760_s4] ss:$0 sm:$0xff] }
 0x15d   :  { %vm4912_vm4 = vmmov %vm4863_vm0 }
 0x15f   :  { %3223 = vmatmul.mubr.msk.f32.gmra.mrb[20].mxu1 %vm4863_vm0, %v1180_v29 }
 0x160   :  { %3225 = vmatprep.mubr.msk.f32.mxu1 %vm4893_vm1, %v4109_v50  ;;  %vm4907_vm1 = vnez %v4906_v4  ;;  %v4917_v50 = vld [vmem:[#allocation9_spill] sm:$0xff] }
 0x161   :  { %v1186_v6 = vsel %vm4907_vm1, 0.0, %v4905_v25  ;;  %vm4919_vm1 = vmmov %vm4912_vm4 }
 0x163   :  { %3226 = vmatmul.mubr.msk.f32.gmra.mrb[22].mxu1 %vm4897_vm14, %v1182_v46  ;;  %vm4909_vm14 = vmmov %vm4863_vm0 }
 0x164   :  { %3228 = vmatprep.mubr.msk.f32.mxu1 %vm4899_vm15, %v4898_v13  ;;  %vm4911_vm15 = vnez %v4910_v1 }
 0x165   :  { %v1188_v8 = vsel %vm4911_vm15, 0.0, %v4190_v3  ;;  %v1935_v3 = vld [vmem:[%s4761_s5 + $0x8] sm:$0xff] }
 0x166   :  { %v3379_v30 = vpack.c.bf16 %v1935_v3, %v1934_v11 }
 0x167   :  { %3229 = vmatmul.mubr.msk.f32.gmra.mrb[24].mxu1 %vm4903_vm9, %v1184_v18  ;;  %vm4913_vm9 = vcmp.lt.s32.totalorder %v3632_v15, 7 }
 0x168   :  { %3231 = vmatprep.mubr.msk.f32.mxu1 %vm4863_vm0, %v4904_v16  ;;  %v1159_v44 = vsel %vm4913_vm9, %v1157_v48, %v1158_v42  ;;  %vm4915_vm0 = vmmov %vm4913_vm9  ;;  %3380 = vmatprep.subr.bf16.mxu0 %v3379_v30 }
 0x169   :  { %v1174_v40 = vsel %vm4915_vm0, %v1158_v42, %v4914_v60  ;;  %3382 = vmatpush3.bf16.msra.mxu0 %v3379_v30 }
 0x16a   :  { %3384 = vmatprep.subr.bf16.mxu0 %v3383_v28 }
 0x16b   :  { %3232 = vmatmul.mubr.msk.f32.gmra.mrb[26].mxu1 %vm4908_vm6, %v1186_v6  ;;  %vm4916_vm6 = vmmov %vm4912_vm4 }
 0x16c   :  { %3234 = vmatprep.mubr.msk.f32.mxu1 %vm4909_vm14, %v4176_v19  ;;  %vm4918_vm14 = vnez %v4917_v50 }
 0x16d   :  { %v1190_v58 = vsel %vm4918_vm14, 0.0, %v1174_v40  ;;  %3386 = vmatpush3.bf16.msra.mxu0 %v3383_v28 }
 0x16e   :  { %3388 = vmatprep.subr.bf16.mxu0 %v4337_v62 }
 0x16f   :  { %3235 = vmatmul.mubr.msk.f32.gmra.mrb[28].mxu1 %vm4912_vm4, %v1188_v8  ;;  %vm4920_vm4 = vcmp.lt.s32.totalorder %v3632_v15, 1  ;;  %v2625_v15 = vld [vmem:[%s4763_s7 + $0x10] sm:$0xff] }
 0x170   :  { %3237 = vmatprep.mubr.msk.f32.mxu1 %vm4916_vm6, %v1159_v44  ;;  %vm4922_vm9 = vmmov %vm4920_vm4 }
 0x173   :  { %3238 = vmatmul.mubr.msk.f32.gmra.mrb[30].mxu1 %vm4919_vm1, %v1190_v58  ;;  %vm4921_vm1 = vmmov %vm4915_vm0 }
 0x174   :  { %vm4923_vm0 = vmmov %vm4920_vm4 }
 0x175   :  { %vm4924_vm6 = vmmov %vm4921_vm1 }
 0x22a   :  { %v3218_v35 = vpop.f32.mrb[16].mxu1 }
 0x22b   :  { %v1802_v52 = vadd.f32 %v3218_v35, %v4343_v9  ;;  %v1699_v23 = vpop.f32.mrb[17].mxu1 }
 0x22c   :  { %v1801_v21 = vadd.f32 %v4343_v9, %v1699_v23 }
 0x22d   :  { %v4347_v2 = vmax.f32 %v1802_v52, 0.0 }
 0x22e   :  { %v4349_v39 = vmax.f32 %v1801_v21, 0.0  ;;  %v3221_v63 = vpop.f32.mrb[18].mxu1 }
 0x22f   :  { %v1834_v41 = vrot.slane %v4347_v2, 7  ;;  %v1882_v48 = vrot.slane %v4347_v2, 1  ;;  %v1804_v19 = vadd.f32 %v3221_v63, %v4343_v9  ;;  %v1709_v33 = vpop.f32.mrb[19].mxu1 }
 0x230   :  { %v4794_v47 = vrot.slane %v4349_v39, 7  ;;  %v4793_v61 = vrot.slane %v4349_v39, 1  ;;  %v1803_v7 = vadd.f32 %v4343_v9, %v1709_v33 }
 0x231   :  { %v4357_v14 = vmax.f32 %v1804_v19, 0.0 }
 0x232   :  { %v4359_v51 = vmax.f32 %v1803_v7, 0.0  ;;  %v3224_v36 = vpop.f32.mrb[20].mxu1  ;;  %v4365_v56 = vsel %vm4920_vm4, %v4794_v47, %v1834_v41  ;;  %v4371_v32 = vsel %vm4921_vm1, %v4793_v61, %v1882_v48  ;;  %vm4925_vm4 = vmmov %vm4921_vm1 }
 0x233   :  { %v1836_v24 = vrot.slane %v4357_v14, 7  ;;  %v1806_v12 = vadd.f32 %v3224_v36, %v4343_v9  ;;  %v1719_v26 = vpop.f32.mrb[21].mxu1  ;;  %v1884_v13 = vrot.slane %v4357_v14, 1  ;;  %vm4926_vm1 = vmmov %vm4923_vm0 }
 0x234   :  { %v1835_v29 = vrot.slane %v4359_v51, 7  ;;  %v1883_v55 = vrot.slane %v4359_v51, 1  ;;  %v1805_v46 = vadd.f32 %v4343_v9, %v1719_v26 }
 0x235   :  { %v4379_v53 = vmax.f32 %v1806_v12, 0.0 }
 0x236   :  { %v4381_v18 = vmax.f32 %v1805_v46, 0.0  ;;  %v3227_v16 = vpop.f32.mrb[22].mxu1  ;;  %v4385_v25 = vsel %vm4922_vm9, %v1834_v41, %v1835_v29  ;;  %v4389_v6 = vsel %vm4923_vm0, %v1835_v29, %v1836_v24  ;;  %v4393_v42 = vsel %vm4924_vm6, %v1882_v48, %v1883_v55  ;;  %vm4927_vm9 = vmmov %vm4923_vm0 }
 0x237   :  { %v1838_v8 = vrot.slane %v4379_v53, 7  ;;  %v1808_v44 = vadd.f32 %v3227_v16, %v4343_v9  ;;  %v1729_v60 = vpop.f32.mrb[23].mxu1  ;;  %v1886_v3 = vrot.slane %v4379_v53, 1  ;;  %v4405_v20 = vsel %vm4925_vm4, %v1883_v55, %v1884_v13  ;;  %vm4928_vm0 = vmmov %vm4925_vm4 }
 0x238   :  { %v1837_v40 = vrot.slane %v4381_v18, 7  ;;  %v1885_v58 = vrot.slane %v4381_v18, 1  ;;  %v1807_v11 = vadd.f32 %v4343_v9, %v1729_v60  ;;  %vm4929_vm6 = vmmov %vm4928_vm0 }
 0x239   :  { %v4401_v30 = vmax.f32 %v1808_v44, 0.0  ;;  %vm4930_vm4 = vmmov %vm4926_vm1 }
 0x23a   :  { %v4407_v31 = vmax.f32 %v1807_v11, 0.0  ;;  %v3230_v28 = vpop.f32.mrb[24].mxu1  ;;  %v4411_v49 = vsel %vm4926_vm1, %v1836_v24, %v1837_v40  ;;  %v4415_v5 = vsel %vm4927_vm9, %v1837_v40, %v1838_v8  ;;  %v4419_v35 = vsel %vm4928_vm0, %v1884_v13, %v1885_v58  ;;  %vm4931_vm9 = vmmov %vm4928_vm0 }
 0x23b   :  { %v1840_v52 = vrot.slane %v4401_v30, 7  ;;  %v1810_v23 = vadd.f32 %v3230_v28, %v4343_v9  ;;  %v1739_v21 = vpop.f32.mrb[25].mxu1  ;;  %v1888_v19 = vrot.slane %v4401_v30, 1  ;;  %v4431_v7 = vsel %vm4929_vm6, %v1885_v58, %v1886_v3  ;;  %vm4932_vm6 = vmmov %vm4926_vm1 }
 0x23c   :  { %v1839_v63 = vrot.slane %v4407_v31, 7  ;;  %v1887_v41 = vrot.slane %v4407_v31, 1  ;;  %v1809_v48 = vadd.f32 %v4343_v9, %v1739_v21 }
 0x23d   :  { %v4427_v33 = vmax.f32 %v1810_v23, 0.0 }
 0x23e   :  { %v4433_v36 = vmax.f32 %v1809_v48, 0.0  ;;  %v3233_v24 = vpop.f32.mrb[26].mxu1  ;;  %v4437_v12 = vsel %vm4930_vm4, %v1838_v8, %v1839_v63  ;;  %v4441_v26 = vsel %vm4926_vm1, %v1839_v63, %v1840_v52  ;;  %v4445_v29 = vsel %vm4931_vm9, %v1886_v3, %v1887_v41  ;;  %vm4933_vm4 = vmmov %vm4926_vm1 }
 0x23f   :  { %v1842_v55 = vrot.slane %v4427_v33, 7  ;;  %v1812_v46 = vadd.f32 %v3233_v24, %v4343_v9  ;;  %v1749_v13 = vpop.f32.mrb[27].mxu1  ;;  %v1890_v60 = vrot.slane %v4427_v33, 1  ;;  %v4457_v58 = vsel %vm4928_vm0, %v1887_v41, %v1888_v19  ;;  %vm4934_vm1 = vmmov %vm4928_vm0 }
 0x240   :  { %v1841_v16 = vrot.slane %v4433_v36, 7  ;;  %v1889_v44 = vrot.slane %v4433_v36, 1  ;;  %v1811_v8 = vadd.f32 %v4343_v9, %v1749_v13  ;;  %vm4936_vm9 = vmmov %vm4928_vm0  ;;  %v1871_v34 = vsel %vm3741_vm5, 0.0, %v4437_v12 }
 0x241   :  { %v4453_v40 = vmax.f32 %v1812_v46, 0.0  ;;  %vm4938_vm0 = vmmov %vm4933_vm4  ;;  %v3541_v12 = vmov 0.0|0.0  }
 0x242   :  { %v4459_v11 = vmax.f32 %v1811_v8, 0.0  ;;  %v3236_v3 = vpop.f32.mrb[28].mxu1  ;;  %v1856_v28 = vsel %vm4932_vm6, %v1840_v52, %v1841_v16  ;;  %v1855_v23 = vsel %vm4933_vm4, %v1841_v16, %v1842_v55  ;;  %v4467_v21 = vsel %vm4934_vm1, %v1888_v19, %v1889_v44  ;;  %vm4939_vm6 = vmmov %vm4938_vm0  ;;  %3403 = vmatprep.subr.bf16.mxu1 %v3541_v12 }
 0x243   :  { %4935 = vst [vmem:[#allocation10_spill] sm:$0xff] %v4467_v21  ;;  %v1844_v63 = vrot.slane %v4453_v40, 7  ;;  %v1814_v48 = vadd.f32 %v3236_v3, %v4343_v9  ;;  %v1759_v24 = vpop.f32.mrb[29].mxu1  ;;  %v1892_v52 = vrot.slane %v4453_v40, 1  ;;  %v4479_v16 = vsel %vm4936_vm9, %v1889_v44, %v1890_v60  ;;  %vm4940_vm4 = vmmov %vm4934_vm1 }
 0x244   :  { %v1843_v41 = vrot.slane %v4459_v11, 7  ;;  %v1891_v46 = vrot.slane %v4459_v11, 1  ;;  %v1813_v13 = vadd.f32 %v4343_v9, %v1759_v24  ;;  %4937 = vst [vmem:[#allocation11_spill] sm:$0xff] %v4479_v16  ;;  %vm4943_vm9 = vmmov %vm4938_vm0 }
 0x245   :  { %v4475_v8 = vmax.f32 %v1814_v48, 0.0  ;;  %vm4951_vm5 = vmmov %vm4938_vm0 }
 0x246   :  { %v4481_v19 = vmax.f32 %v1813_v13, 0.0  ;;  %v3239_v61 = vpop.f32.mrb[30].mxu1  ;;  %v1854_v3 = vsel %vm4938_vm0, %v1842_v55, %v1843_v41  ;;  %v1853_v47 = vsel %vm4939_vm6, %v1843_v41, %v1844_v63  ;;  %v4489_v24 = vsel %vm4940_vm4, %v1890_v60, %v1891_v46  ;;  %vm4944_vm6 = vmmov %vm4934_vm1 }
 0x247   :  { %4941 = vst [vmem:[#allocation12_spill] sm:$0xff] %v4489_v24  ;;  %v1846_v48 = vrot.slane %v4475_v8, 7  ;;  %v1816_v50 = vadd.f32 %v3239_v61, %v4343_v9  ;;  %v1769_v1 = vpop.f32.mrb[31].mxu1  ;;  %v1894_v44 = vrot.slane %v4475_v8, 1  ;;  %v4501_v41 = vsel %vm4934_vm1, %v1891_v46, %v1892_v52 }
 0x248   :  { %v1845_v13 = vrot.slane %v4481_v19, 7  ;;  %v1893_v4 = vrot.slane %v4481_v19, 1  ;;  %v1815_v55 = vadd.f32 %v4343_v9, %v1769_v1  ;;  %4942 = vst [vmem:[#allocation13_spill] sm:$0xff] %v4501_v41  ;;  %v2839_v9 = vld [vmem:[%s4761_s5 + $0x38] sm:$0xff]  ;;  %vm1938_vm4 = vcmask 261120  }
 0x249   :  { %v4497_v10 = vmax.f32 %v1816_v50, 0.0  ;;  %v2838_v50 = vld [vmem:[%s4761_s5 + $0x30] sm:$0xff] }
 0x24a   :  { %v4503_v60 = vmax.f32 %v1815_v55, 0.0  ;;  %v1852_v61 = vsel %vm4943_vm9, %v1844_v63, %v1845_v13  ;;  %v1851_v24 = vsel %vm4938_vm0, %v1845_v13, %v1846_v48  ;;  %v4511_v16 = vsel %vm4944_vm6, %v1892_v52, %v1893_v4  ;;  %vm4947_vm9 = vmmov %vm4938_vm0  ;;  %v4952_v17 = vld [vmem:[#allocation10_spill] sm:$0xff] }
 0x24b   :  { %4945 = vst [vmem:[#allocation14_spill] sm:$0xff] %v4511_v16  ;;  %v1848_v1 = vrot.slane %v4497_v10, 7  ;;  %v4524_v13 = vsel %vm4934_vm1, %v1893_v4, %v1894_v44  ;;  %v4946_v52 = vrot.slane %v4349_v39, 7  ;;  %v3391_v41 = vpack.c.bf16 %v2839_v9, %v2838_v50  ;;  %vm4948_vm6 = vmmov %vm4934_vm1  ;;  %v2872_v4 = vld [vmem:[%s4761_s5 + $0x40] sm:$0xff]  ;;  %v4955_v38 = vld [vmem:[#allocation11_spill] sm:$0xff] }
 0x24c   :  { %v1847_v46 = vrot.slane %v4503_v60, 7  ;;  %v1895_v63 = vrot.slane %v4503_v60, 1  ;;  %v1877_v57 = vsel %vm3841_vm11, 0.0, %v1852_v61  ;;  %vm4964_vm11 = vmmov %vm4934_vm1 }
 0x24d   :  { %v1864_v55 = vsel %vm4947_vm9, %v1848_v1, %v4946_v52 }
 0x24e   :  { %v1865_v16 = vsel %vm3668_vm2, 0.0, %v1864_v55  ;;  %v1850_v37 = vsel %vm4938_vm0, %v1846_v48, %v1847_v46  ;;  %v4538_v21 = vsel %vm4948_vm6, %v1894_v44, %v1895_v63  ;;  %v1867_v48 = vsel %vm3686_vm3, 0.0, %v4385_v25 }
 0x24f   :  { %3248 = vmatprep.mubr.msk.f32.mxu0 %vm1938_vm4, %v1865_v16  ;;  %v3395_v16 = vpack.c.bf16 %v2873_v27, %v2872_v4  ;;  %vm4949_vm2 = vnez %v4800_v45  ;;  %v1873_v45 = vsel %vm3758_vm7, 0.0, %v1856_v28  ;;  %vm4950_vm3 = vnez %v4808_v22  ;;  %v4959_v54 = vld [vmem:[#allocation13_spill] sm:$0xff]  ;;  %v2629_v28 = vld [vmem:[%s4763_s7 + $0x30] sm:$0xff] }
 0x250   :  { %3249 = vmatmul.mubr.msk.f32.vlgmr.msra.gmra.mrb[16].mxu0 %vm1938_vm4, %v4365_v56  ;;  %v1869_v44 = vsel %vm4949_vm2, 0.0, %v4411_v49  ;;  %v1879_v0 = vsel %vm3868_vm13, 0.0, %v1850_v37  ;;  %v1849_v22 = vsel %vm4951_vm5, %v1847_v46, %v1848_v1  ;;  %v2874_v56 = vld [vmem:[%s4761_s5 + $0x50] sm:$0xff]  ;;  %v1914_v37 = vsel %vm3790_vm8, 0.0, %v4393_v42 }
 0x251   :  { %3251 = vmatprep.mubr.msk.f32.mxu0 %vm1938_vm4, %v1867_v48  ;;  %3390 = vmatpush3.bf16.msra.mxu0 %v4337_v62  ;;  %v1875_v62 = vsel %vm4950_vm3, 0.0, %v1854_v3  ;;  %v3399_v59 = vpack.c.bf16 %v2875_v43, %v2874_v56  ;;  %vm3542_vm13 = vmmov 0  }
 0x252   :  { %3392 = vmatprep.subr.bf16.mxu0 %v3391_v41  ;;  %v4960_v25 = vld [vmem:[#allocation14_spill] sm:$0xff] }
 0x254   :  { %3252 = vmatmul.mubr.msk.f32.gmra.mrb[18].mxu0 %vm1938_vm4, %v4389_v6  ;;  %v4961_v6 = vld [vmem:[#allocation7_spill] sm:$0xff] }
 0x255   :  { %3254 = vmatprep.mubr.msk.f32.mxu0 %vm1938_vm4, %v1869_v44  ;;  %3394 = vmatpush3.bf16.msra.mxu0 %v3391_v41 }
 0x256   :  { %3396 = vmatprep.subr.bf16.mxu0 %v3395_v16 }
 0x258   :  { %3255 = vmatmul.mubr.msk.f32.gmra.mrb[20].mxu0 %vm1938_vm4, %v4415_v5  ;;  %v4965_v5 = vrot.slane %v4349_v39, 1 }
 0x259   :  { %3257 = vmatprep.mubr.msk.f32.mxu0 %vm1938_vm4, %v1871_v34 }
 0x25c   :  { %3258 = vmatmul.mubr.msk.f32.gmra.mrb[22].mxu0 %vm1938_vm4, %v4441_v26  ;;  %v2626_v26 = vld [vmem:[%s4763_s7 + $0x18] sm:$0xff] }
 0x25d   :  { %3260 = vmatprep.mubr.msk.f32.mxu0 %vm1938_vm4, %v1873_v45 }
 0x260   :  { %3261 = vmatmul.mubr.msk.f32.gmra.mrb[24].mxu0 %vm1938_vm4, %v1855_v23  ;;  %v2630_v23 = vld [vmem:[%s4763_s7 + $0x38] sm:$0xff] }
 0x261   :  { %3263 = vmatprep.mubr.msk.f32.mxu0 %vm1938_vm4, %v1875_v62 }
 0x264   :  { %3264 = vmatmul.mubr.msk.f32.gmra.mrb[26].mxu0 %vm1938_vm4, %v1853_v47  ;;  %v1918_v47 = vsel %vm3862_vm12, 0.0, %v4445_v29  ;;  %vm4966_vm12 = vmmov %vm4934_vm1  ;;  %v3407_v29 = vpack.c.bf16 %v2626_v26, %v2625_v15 }
 0x265   :  { %3266 = vmatprep.mubr.msk.f32.mxu0 %vm1938_vm4, %v1877_v57 }
 0x268   :  { %3267 = vmatmul.mubr.msk.f32.gmra.mrb[28].mxu0 %vm1938_vm4, %v1851_v24 }
 0x269   :  { %3269 = vmatprep.mubr.msk.f32.mxu0 %vm1938_vm4, %v1879_v0 }
 0x26c   :  { %3270 = vmatmul.mubr.msk.f32.gmra.mrb[30].mxu0 %vm1938_vm4, %v1849_v22 }
 0x26d   :  { %3280 = vmatprep.mubr.msk.f32.mxu0 %vm1938_vm4, %v4349_v39 }
 0x270   :  { %3281 = vmatmul.mubr.msk.f32.vlgmr.msra.gmra.mrb[16].mxu0 %vm1938_vm4, %v4347_v2  ;;  %v1916_v2 = vsel %vm3830_vm10, 0.0, %v4419_v35  ;;  %vm4962_vm10 = vnez %v4961_v6 }
 0x271   :  { %3283 = vmatprep.mubr.msk.f32.mxu0 %vm1938_vm4, %v4359_v51  ;;  %3398 = vmatpush3.bf16.msra.mxu0 %v3395_v16  ;;  %v1924_v42 = vsel %vm4962_vm10, 0.0, %v4960_v25 }
 0x272   :  { %3400 = vmatprep.subr.bf16.mxu0 %v3399_v59 }
 0x274   :  { %3284 = vmatmul.mubr.msk.f32.gmra.mrb[18].mxu0 %vm1938_vm4, %v4357_v14  ;;  %v4953_v14 = vld [vmem:[#allocation5_spill] sm:$0xff] }
 0x275   :  { %3286 = vmatprep.mubr.msk.f32.mxu0 %vm1938_vm4, %v4381_v18  ;;  %3402 = vmatpush3.bf16.msra.mxu0 %v3399_v59  ;;  %vm4954_vm7 = vnez %v4953_v14 }
 0x276   :  { %v1920_v51 = vsel %vm4954_vm7, 0.0, %v4952_v17 }
 0x278   :  { %3287 = vmatmul.mubr.msk.f32.gmra.mrb[20].mxu0 %vm1938_vm4, %v4379_v53  ;;  %v4957_v53 = vld [vmem:[#allocation6_spill] sm:$0xff] }
 0x279   :  { %3289 = vmatprep.mubr.msk.f32.mxu0 %vm1938_vm4, %v4407_v31  ;;  %vm4958_vm8 = vnez %v4957_v53  ;;  %v1926_v31 = vsel %vm4911_vm15, 0.0, %v4538_v21  ;;  %v3413_v21 = vpack.c.bf16 %v2630_v23, %v2629_v28  ;;  %vm2578_vm15 = vcmask 523264  }
 0x27c   :  { %3290 = vmatmul.mubr.msk.f32.gmra.mrb[22].mxu0 %vm1938_vm4, %v4401_v30  ;;  %v1896_v30 = vrot.slane %v4497_v10, 1 }
 0x27d   :  { %3292 = vmatprep.mubr.msk.f32.mxu0 %vm1938_vm4, %v4433_v36  ;;  %v2624_v36 = vld [vmem:[%s4763_s7 + $0x8] sm:$0xff] }
 0x27e   :  { %v1897_v49 = vsel %vm4964_vm11, %v1895_v63, %v1896_v30 }
 0x280   :  { %3293 = vmatmul.mubr.msk.f32.gmra.mrb[24].mxu0 %vm1938_vm4, %v4427_v33 }
 0x281   :  { %3295 = vmatprep.mubr.msk.f32.mxu0 %vm1938_vm4, %v4459_v11 }
 0x284   :  { %3296 = vmatmul.mubr.msk.f32.gmra.mrb[26].mxu0 %vm1938_vm4, %v4453_v40  ;;  %v2627_v40 = vld [vmem:[%s4763_s7 + $0x20] sm:$0xff] }
 0x285   :  { %3298 = vmatprep.mubr.msk.f32.mxu0 %vm1938_vm4, %v4481_v19  ;;  %v4706_v19 = vld [vmem:[%s4762_s6] ss:$0 sm:$0xff] }
 0x288   :  { %3299 = vmatmul.mubr.msk.f32.gmra.mrb[28].mxu0 %vm1938_vm4, %v4475_v8  ;;  %v3543_v8 = vmov 0.0  }
 0x289   :  { %3301 = vmatprep.mubr.msk.f32.mxu0 %vm1938_vm4, %v4503_v60  ;;  %3352 = vmatprep.mubr.msk.f32.mxu1 %vm3542_vm13, %v3543_v8 }
 0x28c   :  { %3302 = vmatmul.mubr.msk.f32.gmra.mrb[30].mxu0 %vm1938_vm4, %v4497_v10  ;;  %v1912_v10 = vsel %vm4966_vm12, %v1896_v30, %v4965_v5 }
 0x28d   :  { %3312 = vmatprep.mubr.msk.f32.mxu0 %vm1938_vm4, %v4371_v32  ;;  %v4956_v32 = vld [vmem:[#allocation12_spill] sm:$0xff]  ;;  %v1928_v33 = vsel %vm4918_vm14, 0.0, %v1912_v10  ;;  %vm2640_vm14 = vcmask 1041409  }
 0x28e   :  { %v1922_v18 = vsel %vm4958_vm8, 0.0, %v4956_v32 }
 0x290   :  { %3313 = vmatmul.mubr.msk.f32.vlgmr.msra.gmra.mrb[16].mxu0 %vm1938_vm4, %v1914_v37 }
 0x291   :  { %3315 = vmatprep.mubr.msk.f32.mxu0 %vm1938_vm4, %v4405_v20 }
 0x294   :  { %3316 = vmatmul.mubr.msk.f32.gmra.mrb[18].mxu0 %vm1938_vm4, %v1916_v2 }
 0x295   :  { %3318 = vmatprep.mubr.msk.f32.mxu0 %vm1938_vm4, %v4431_v7  ;;  %v2623_v7 = vld [vmem:[%s4763_s7] sm:$0xff] }
 0x296   :  { %v3404_v39 = vpack.c.bf16 %v2624_v36, %v2623_v7 }
 0x298   :  { %3319 = vmatmul.mubr.msk.f32.gmra.mrb[20].mxu0 %vm1938_vm4, %v1918_v47  ;;  %3405 = vmatpush3.bf16.msra.mxu1 %v3404_v39 }
 0x299   :  { %3321 = vmatprep.mubr.msk.f32.mxu0 %vm1938_vm4, %v4457_v58  ;;  %3406 = vmatprep.subr.bf16.mxu1 %v3541_v12  ;;  %v2628_v58 = vld [vmem:[%s4763_s7 + $0x28] sm:$0xff] }
 0x29a   :  { %v3410_v11 = vpack.c.bf16 %v2628_v58, %v2627_v40 }
 0x29c   :  { %3322 = vmatmul.mubr.msk.f32.gmra.mrb[22].mxu0 %vm1938_vm4, %v1920_v51  ;;  %3408 = vmatpush3.bf16.msra.mxu1 %v3407_v29 }
 0x29d   :  { %3324 = vmatprep.mubr.msk.f32.mxu0 %vm1938_vm4, %v4955_v38  ;;  %3409 = vmatprep.subr.bf16.mxu1 %v3541_v12 }
 0x2a0   :  { %3325 = vmatmul.mubr.msk.f32.gmra.mrb[24].mxu0 %vm1938_vm4, %v1922_v18  ;;  %3411 = vmatpush3.bf16.msra.mxu1 %v3410_v11 }
 0x2a1   :  { %3327 = vmatprep.mubr.msk.f32.mxu0 %vm1938_vm4, %v4959_v54  ;;  %3412 = vmatprep.subr.bf16.mxu1 %v3541_v12 }
 0x2a4   :  { %3328 = vmatmul.mubr.msk.f32.gmra.mrb[26].mxu0 %vm1938_vm4, %v1924_v42  ;;  %3414 = vmatpush3.bf16.msra.mxu1 %v3413_v21 }
 0x2a5   :  { %3330 = vmatprep.mubr.msk.f32.mxu0 %vm1938_vm4, %v4524_v13 }
 0x2a8   :  { %3331 = vmatmul.mubr.msk.f32.gmra.mrb[28].mxu0 %vm1938_vm4, %v1926_v31 }
 0x2a9   :  { %3333 = vmatprep.mubr.msk.f32.mxu0 %vm1938_vm4, %v1897_v49 }
 0x2ac   :  { %3334 = vmatmul.mubr.msk.f32.gmra.mrb[30].mxu0 %vm1938_vm4, %v1928_v33  ;;  %vm2714_vm4 = vcmask 254976  }
 0x363   :  { %v3314_v3 = vpop.f32.mrb[16].mxu0 }
 0x364   :  { %v2547_v24 = vadd.f32 %v3314_v3, %v4706_v19  ;;  %v2444_v41 = vpop.f32.mrb[17].mxu0 }
 0x365   :  { %v2546_v60 = vadd.f32 %v4706_v19, %v2444_v41 }
 0x366   :  { %v2563_v61 = vmax.f32 %v2547_v24, 0.0 }
 0x367   :  { %v2562_v1 = vmax.f32 %v2546_v60, 0.0  ;;  %v3317_v50 = vpop.f32.mrb[18].mxu0 }
 0x368   :  { %v2580_v9 = vsel %vm2578_vm15, %v2563_v61, 0.0  ;;  %v2549_v46 = vadd.f32 %v3317_v50, %v4706_v19  ;;  %v2454_v63 = vpop.f32.mrb[19].mxu0 }
 0x369   :  { %v2579_v13 = vsel %vm2578_vm15, %v2562_v1, 0.0  ;;  %v2548_v52 = vadd.f32 %v4706_v19, %v2454_v63 }
 0x36a   :  { %v2581_v55 = vadd.f32 %v2580_v9, %v2579_v13  ;;  %v2565_v4 = vmax.f32 %v2549_v46, 0.0 }
 0x36b   :  { %v2564_v27 = vmax.f32 %v2548_v52, 0.0  ;;  %v3320_v48 = vpop.f32.mrb[20].mxu0 }
 0x36c   :  { %v2551_v16 = vadd.f32 %v3320_v48, %v4706_v19  ;;  %v2464_v44 = vpop.f32.mrb[21].mxu0  ;;  %v2584_v57 = vsel %vm2578_vm15, %v2565_v4, 0.0 }
 0x36d   :  { %v2582_v34 = vsel %vm2578_vm15, %v2564_v27, 0.0  ;;  %v2550_v45 = vadd.f32 %v4706_v19, %v2464_v44 }
 0x36e   :  { %v2583_v62 = vadd.f32 %v2582_v34, %v2581_v55  ;;  %v2567_v0 = vmax.f32 %v2551_v16, 0.0 }
 0x36f   :  { %v2566_v22 = vmax.f32 %v2550_v45, 0.0  ;;  %v3323_v56 = vpop.f32.mrb[22].mxu0 }
 0x370   :  { %v2585_v43 = vadd.f32 %v2584_v57, %v2583_v62  ;;  %v2553_v59 = vadd.f32 %v3323_v56, %v4706_v19  ;;  %v2474_v37 = vpop.f32.mrb[23].mxu0  ;;  %v2588_v14 = vsel %vm2578_vm15, %v2567_v0, 0.0 }
 0x371   :  { %v2586_v2 = vsel %vm2578_vm15, %v2566_v22, 0.0  ;;  %v2552_v47 = vadd.f32 %v4706_v19, %v2474_v37 }
 0x372   :  { %v2587_v17 = vadd.f32 %v2586_v2, %v2585_v43  ;;  %v2569_v51 = vmax.f32 %v2553_v59, 0.0 }
 0x373   :  { %v2568_v38 = vmax.f32 %v2552_v47, 0.0  ;;  %v3326_v32 = vpop.f32.mrb[24].mxu0  ;;  %v2893_v47 = vld [vmem:[%s4764_s8] ss:$0 sm:$0xff] }
 0x374   :  { %v2589_v53 = vadd.f32 %v2588_v14, %v2587_v17  ;;  %v2555_v18 = vadd.f32 %v3326_v32, %v4706_v19  ;;  %v2484_v54 = vpop.f32.mrb[25].mxu0  ;;  %v2592_v20 = vsel %vm2578_vm15, %v2569_v51, 0.0 }
 0x375   :  { %v2590_v25 = vsel %vm2578_vm15, %v2568_v38, 0.0  ;;  %v2554_v6 = vadd.f32 %v4706_v19, %v2484_v54 }
 0x376   :  { %v2591_v42 = vadd.f32 %v2590_v25, %v2589_v53  ;;  %v2571_v30 = vmax.f32 %v2555_v18, 0.0 }
 0x377   :  { %v2570_v31 = vmax.f32 %v2554_v6, 0.0  ;;  %v3329_v49 = vpop.f32.mrb[26].mxu0 }
 0x378   :  { %v2593_v5 = vadd.f32 %v2592_v20, %v2591_v42  ;;  %v2601_v10 = vsel %vm2578_vm15, %v2571_v30, 0.0  ;;  %v2557_v35 = vadd.f32 %v3329_v49, %v4706_v19  ;;  %v2494_v33 = vpop.f32.mrb[27].mxu0 }
 0x379   :  { %v2600_v7 = vsel %vm2578_vm15, %v2570_v31, 0.0  ;;  %v2556_v36 = vadd.f32 %v4706_v19, %v2494_v33 }
 0x37a   :  { %v2602_v12 = vadd.f32 %v2601_v10, %v2600_v7  ;;  %v2573_v39 = vmax.f32 %v2557_v35, 0.0  ;;  %v2594_v28 = vrot.slane %v2593_v5, 4 }
 0x37b   :  { %v2572_v15 = vmax.f32 %v2556_v36, 0.0  ;;  %v3332_v26 = vpop.f32.mrb[28].mxu0 }
 0x37c   :  { %v2559_v29 = vadd.f32 %v3332_v26, %v4706_v19  ;;  %v2504_v40 = vpop.f32.mrb[29].mxu0  ;;  %v2605_v21 = vsel %vm2578_vm15, %v2573_v39, 0.0  ;;  %v2595_v9 = vadd.f32 %v2594_v28, %v2593_v5 }
 0x37d   :  { %v2603_v58 = vsel %vm2578_vm15, %v2572_v15, 0.0  ;;  %v2558_v11 = vadd.f32 %v4706_v19, %v2504_v40 }
 0x37e   :  { %v2604_v23 = vadd.f32 %v2603_v58, %v2602_v12  ;;  %v2575_v8 = vmax.f32 %v2559_v29, 0.0  ;;  %v2596_v27 = vrot.slane %v2595_v9, 2 }
 0x37f   :  { %v2574_v3 = vmax.f32 %v2558_v11, 0.0  ;;  %v3335_v24 = vpop.f32.mrb[30].mxu0 }
 0x380   :  { %v2606_v41 = vadd.f32 %v2605_v21, %v2604_v23  ;;  %v2561_v60 = vadd.f32 %v3335_v24, %v4706_v19  ;;  %v2514_v61 = vpop.f32.mrb[31].mxu0  ;;  %v2609_v63 = vsel %vm2578_vm15, %v2575_v8, 0.0  ;;  %v2597_v34 = vadd.f32 %v2596_v27, %v2595_v9 }
 0x381   :  { %v2607_v1 = vsel %vm2578_vm15, %v2574_v3, 0.0  ;;  %v2560_v50 = vadd.f32 %v4706_v19, %v2514_v61 }
 0x382   :  { %v2608_v46 = vadd.f32 %v2607_v1, %v2606_v41  ;;  %v2577_v13 = vmax.f32 %v2561_v60, 0.0  ;;  %v2598_v57 = vrot.slane %v2597_v34, 1 }
 0x383   :  { %v2576_v52 = vmax.f32 %v2560_v50, 0.0 }
 0x384   :  { %v2610_v55 = vadd.f32 %v2609_v63, %v2608_v46  ;;  %v2613_v16 = vsel %vm2578_vm15, %v2577_v13, 0.0  ;;  %v2599_v22 = vadd.f32 %v2598_v57, %v2597_v34 }
 0x385   :  { %v2611_v4 = vsel %vm2578_vm15, %v2576_v52, 0.0 }
 0x386   :  { %v2612_v48 = vadd.f32 %v2611_v4, %v2610_v55  ;;  %v2621_v59 = vmul.f32 0.015625, %v2599_v22 }
 0x388   :  { %v2614_v44 = vadd.f32 %v2613_v16, %v2612_v48 }
 0x38a   :  { %v2615_v45 = vrot.slane %v2614_v44, 4 }
 0x38c   :  { %v2616_v62 = vadd.f32 %v2615_v45, %v2614_v44 }
 0x38e   :  { %v2617_v0 = vrot.slane %v2616_v62, 2 }
 0x390   :  { %v2618_v19 = vadd.f32 %v2617_v0, %v2616_v62 }
 0x392   :  { %v2619_v56 = vrot.slane %v2618_v19, 1 }
 0x394   :  { %v2620_v43 = vadd.f32 %v2619_v56, %v2618_v19 }
 0x396   :  { %v2622_v37 = vmul.f32 0.015625, %v2620_v43 }
 0x398   :  { %v2641_v2 = vsel %vm2640_vm14, %v2622_v37, %v2621_v59 }
 0x399   :  { %3353 = vmatmul.mubr.msk.f32.vlgmr.msra.gmra.mrb[32].mxu1 %vm2578_vm15, %v2641_v2 }
 0x46c   :  { %v2710_v17 = vpop.f32.mrb[32].mxu1 }
 0x46d   :  { %v2711_v14 = vadd.f32 %v2893_v47, %v2710_v17  ;;  %v3354_v51 = vpop.f32.mrb[33].mxu1 }
 0x46f   :  { %2715 = vst.msk [vmem:[#allocation2] sm:$0x3] %vm2714_vm4, %v2711_v14 }
 0x470   :  { %3528 = shalt.err (!%p3525_p4)
}
 0x471   :  { %s3529_s2 = scalar_lea.hbm %s4765_s9, 32 }
 0x472   :  { %p3530_p5 = scmp.ne.s32.totalorder %s4765_s9, %s3529_s2  ;;  %p3533_p6 = scmp.lt.u32.totalorder %s3529_s2, %s4765_s9 }
 0x474   :  { %p3535_p7 = pnand %p3533_p6, %p3530_p5 }
 0x476   :  { %3538 = shalt.err (!%p3535_p7)
}
 0x477   :  { %2725 = dma.vmem_to_hbm [thread:$0]  %s2723_s14, 32, %s4765_s9, [#allocation3]  }
 0x478   :  { %3539 = dma.done.wait [#allocation3], 32  }
 0x479   :  { %3540 = vsyncadd [#allocation3], 4294967264 }
 0x47a   :  { %2729 = vsyncpa [#allocation3], 1 }

</bundles_post_ra>
